<compile_context>
chip_gen: v5e
topology: v5e:2x2
jax: 0.10.0
libtpu: 0.0.40
codegen_flags: <defaults>
</compile_context>

<pallas_src>
import jax
import jax.numpy as jnp
from jax.experimental import pallas as pl
from jax.experimental.pallas import tpu as pltpu

EMBED_DIM = 30
HIDDEN = 18
HIDDEN_PAD = 32          # 4 * 32 = 128 lanes for the fused i|f|g|o gates
VOCAB = 100

HIGHEST = jax.lax.Precision.HIGHEST


def bilstm_kernel(tok_ref, proj_ref, whh_ref, out_ref, cn_ref):
    """Fused bidirectional LSTM recurrence (single invocation, no grid).

    tok_ref  : (B, T)        int32, SMEM   token ids
    proj_ref : (V, 2, 4*Hp)  f32,   VMEM   emb@W_ih.T + b, gate-padded to 128 lanes
    whh_ref  : (2, Hp, 4*Hp) f32,   VMEM   recurrent weights, gate-padded
    out_ref  : (T, B, 2*Hp)  f32           hidden trajectory, fwd | rev lanes
    cn_ref   : (2, B, Hp)    f32           final cell state per direction
    """
    B, T = tok_ref.shape
    Hp = whh_ref.shape[1]

    whh_f = whh_ref[0]                       # (Hp, 4Hp), loaded once
    whh_r = whh_ref[1]

    # In-kernel gather: one dynamic row load per (batch, time) token; each row
    # holds the precomputed input projection + bias for both directions.
    pre = []
    for t in range(T):
        rows = [proj_ref[tok_ref[b, t]] for b in range(B)]           # (2, 4Hp) each
        pre.append([jnp.concatenate([r[d:d + 1, :] for r in rows], axis=0)
                    for d in range(2)])                               # (B, 4Hp)

    h_f = jnp.zeros((B, Hp), jnp.float32)
    c_f = jnp.zeros((B, Hp), jnp.float32)
    h_r = jnp.zeros((B, Hp), jnp.float32)
    c_r = jnp.zeros((B, Hp), jnp.float32)

    for s in range(T):                        # static unroll; h/c carried in vregs
        # Forward walks t = s, reverse walks t = T-1-s; both chains interleaved.
        g_f = pre[s][0] + jnp.dot(h_f, whh_f, precision=HIGHEST,
                                  preferred_element_type=jnp.float32)
        g_r = pre[T - 1 - s][1] + jnp.dot(h_r, whh_r, precision=HIGHEST,
                                          preferred_element_type=jnp.float32)

        # Whole-tile transcendentals (gate order i, f, g, o at lane offsets k*Hp).
        sg_f = 0.5 * jnp.tanh(0.5 * g_f) + 0.5     # sigmoid of all gates, one EUP op
        th_f = jnp.tanh(g_f)
        sg_r = 0.5 * jnp.tanh(0.5 * g_r) + 0.5
        th_r = jnp.tanh(g_r)

        c_f = sg_f[:, Hp:2 * Hp] * c_f + sg_f[:, :Hp] * th_f[:, 2 * Hp:3 * Hp]
        c_r = sg_r[:, Hp:2 * Hp] * c_r + sg_r[:, :Hp] * th_r[:, 2 * Hp:3 * Hp]
        h_f = sg_f[:, 3 * Hp:] * jnp.tanh(c_f)
        h_r = sg_r[:, 3 * Hp:] * jnp.tanh(c_r)

        out_ref[s, :, :Hp] = h_f              # forward hidden at time s
        out_ref[T - 1 - s, :, Hp:] = h_r      # reverse hidden at time T-1-s

    cn_ref[0] = c_f
    cn_ref[1] = c_r


def my_lstm_forward(tokens, params):
    proj = params["proj"]                     # (V, 2, 4*Hp)
    whh = params["whh"]                       # (2, Hp, 4*Hp)
    B, T = tokens.shape
    Hp = whh.shape[1]
    H = HIDDEN

    out_tbg, cn_pad = pl.pallas_call(
        bilstm_kernel,
        in_specs=[
            pl.BlockSpec(memory_space=pltpu.MemorySpace.SMEM),    # token ids
            pl.BlockSpec(memory_space=pltpu.MemorySpace.VMEM),    # proj table
            pl.BlockSpec(memory_space=pltpu.MemorySpace.VMEM),    # W_hh
        ],
        out_specs=[
            pl.BlockSpec(memory_space=pltpu.MemorySpace.VMEM),
            pl.BlockSpec(memory_space=pltpu.MemorySpace.VMEM),
        ],
        out_shape=[
            jax.ShapeDtypeStruct((T, B, 2 * Hp), jnp.float32),    # hidden trajectory
            jax.ShapeDtypeStruct((2, B, Hp), jnp.float32),        # c_n (padded)
        ],
    )(tokens.astype(jnp.int32), proj, whh)

    # Back to PyTorch batch_first bidirectional layout, dropping lane padding.
    out_btg = jnp.transpose(out_tbg, (1, 0, 2))                   # (B, T, 2*Hp)
    output = jnp.concatenate([out_btg[..., :H], out_btg[..., Hp:Hp + H]], axis=-1)
    h_n = jnp.stack([out_tbg[T - 1, :, :H], out_tbg[0, :, Hp:Hp + H]], axis=0)
    c_n = cn_pad[:, :, :H]
    return output, (h_n, c_n)


def init_params(key):
    kE, k1, k2, k3, k4, k5, k6, k7, k8 = jax.random.split(key, 9)
    emb = jax.random.normal(kE, (VOCAB, EMBED_DIM), jnp.float32)  # nn.Embedding ~ N(0,1)
    bound = 1.0 / (HIDDEN ** 0.5)

    def u(k, shape):
        return jax.random.uniform(k, shape, jnp.float32, -bound, bound)

    # PyTorch parameter layout, gate order i, f, g, o; index 0 = fwd, 1 = reverse.
    w_ih = [u(k1, (4 * HIDDEN, EMBED_DIM)), u(k5, (4 * HIDDEN, EMBED_DIM))]
    w_hh = [u(k2, (4 * HIDDEN, HIDDEN)), u(k6, (4 * HIDDEN, HIDDEN))]
    b_ih = [u(k3, (4 * HIDDEN,)), u(k7, (4 * HIDDEN,))]
    b_hh = [u(k4, (4 * HIDDEN,)), u(k8, (4 * HIDDEN,))]
    return emb, w_ih, w_hh, b_ih, b_hh


def pack_params(emb, w_ih, w_hh, b_ih, b_hh):
    """Fold embedding @ W_ih + biases into a gather table; gate-pad to 128 lanes."""
    H, Hp = HIDDEN, HIDDEN_PAD

    def pad_gates(m):
        # (..., 4H) -> (..., 4*Hp): each H-wide gate block placed at lane k*Hp,
        # zero-padded columns in between (keeps padded h/c lanes exactly zero).
        m4 = m.reshape(m.shape[:-1] + (4, H))
        m4 = jnp.pad(m4, [(0, 0)] * (m4.ndim - 1) + [(0, Hp - H)])
        return m4.reshape(m.shape[:-1] + (4 * Hp,))

    projs, whhs = [], []
    for d in range(2):
        p = (jnp.dot(emb, w_ih[d].T, precision=HIGHEST)
             + b_ih[d] + b_hh[d])                                 # (V, 4H)
        projs.append(pad_gates(p))                                # (V, 4Hp)
        w = pad_gates(w_hh[d].T)                                  # (H, 4Hp)
        whhs.append(jnp.pad(w, ((0, Hp - H), (0, 0))))            # (Hp, 4Hp)
    proj = jnp.stack(projs, axis=1)                               # (V, 2, 4Hp)
    whh = jnp.stack(whhs, axis=0)                                 # (2, Hp, 4Hp)
    return {"proj": proj, "whh": whh}


def ref_forward(tokens, emb, w_ih, w_hh, b_ih, b_hh):
    # Pure-JAX reference mirroring torch.nn.LSTM(bidirectional=True, batch_first=True).
    x = emb[tokens]                              # (B, T, E)
    B, T, _ = x.shape
    H = HIDDEN
    outs, hns, cns = [], [], []
    for d in range(2):
        h = jnp.zeros((B, H), jnp.float32)
        c = jnp.zeros((B, H), jnp.float32)
        out_t = [None] * T
        order = range(T) if d == 0 else range(T - 1, -1, -1)
        for t in order:
            gates = (jnp.dot(x[:, t, :], w_ih[d].T, precision=HIGHEST)
                     + jnp.dot(h, w_hh[d].T, precision=HIGHEST)
                     + b_ih[d] + b_hh[d])
            i = jax.nn.sigmoid(gates[:, :H])
            f = jax.nn.sigmoid(gates[:, H:2 * H])
            g = jnp.tanh(gates[:, 2 * H:3 * H])
            o = jax.nn.sigmoid(gates[:, 3 * H:])
            c = f * c + i * g
            h = o * jnp.tanh(c)
            out_t[t] = h
        outs.append(jnp.stack(out_t, axis=1))
        hns.append(h)
        cns.append(c)
    return jnp.concatenate(outs, axis=-1), (jnp.stack(hns), jnp.stack(cns))


if __name__ == "__main__":
    key = jax.random.PRNGKey(0)
    kp, kt = jax.random.split(key)
    emb, w_ih, w_hh, b_ih, b_hh = init_params(kp)
    params = pack_params(emb, w_ih, w_hh, b_ih, b_hh)

    B, T = 2, 8
    tokens = jax.random.randint(kt, (B, T), 0, VOCAB, dtype=jnp.int32)

    fwd = jax.jit(my_lstm_forward)
    out, (hn, cn) = fwd(tokens, params)
    jax.block_until_ready((out, hn, cn))

    assert out.shape == (B, T, 2 * HIDDEN)
    assert hn.shape == (2, B, HIDDEN) and cn.shape == (2, B, HIDDEN)

    ref_out, (ref_hn, ref_cn) = ref_forward(tokens, emb, w_ih, w_hh, b_ih, b_hh)
    for got, want in ((out, ref_out), (hn, ref_hn), (cn, ref_cn)):
        assert jnp.allclose(got, want, atol=1e-5, rtol=1e-5), float(
            jnp.max(jnp.abs(got - want)))

    print("KERNEL_OK")
</pallas_src>

<mosaic_0001>
module attributes {stable_mosaic.version = 11 : i64} {
  func.func @bilstm_kernel(%arg0: memref<2x8xi32, #tpu.memory_space<smem>>, %arg1: memref<100x2x128xf32, #tpu.memory_space<vmem>>, %arg2: memref<2x32x128xf32, #tpu.memory_space<vmem>>, %arg3: memref<8x2x64xf32, #tpu.memory_space<vmem>>, %arg4: memref<2x2x32xf32, #tpu.memory_space<vmem>>) attributes {dimension_semantics = [], scalar_prefetch = 0 : i64, scratch_operands = 0 : i64, tpu.core_type = #tpu.core_type<tc>} {
    %c0 = arith.constant 0 : index
    %c0_0 = arith.constant 0 : index
    %c0_1 = arith.constant 0 : index
    %0 = vector.load %arg2[%c0, %c0_0, %c0_1] : memref<2x32x128xf32, #tpu.memory_space<vmem>>, vector<1x32x128xf32>
    %1 = vector.shape_cast %0 : vector<1x32x128xf32> to vector<32x128xf32>
    %c1 = arith.constant 1 : index
    %c0_2 = arith.constant 0 : index
    %c0_3 = arith.constant 0 : index
    %2 = vector.load %arg2[%c1, %c0_2, %c0_3] : memref<2x32x128xf32, #tpu.memory_space<vmem>>, vector<1x32x128xf32>
    %3 = vector.shape_cast %2 : vector<1x32x128xf32> to vector<32x128xf32>
    %c0_4 = arith.constant 0 : index
    %c0_5 = arith.constant 0 : index
    %4 = memref.load %arg0[%c0_4, %c0_5] : memref<2x8xi32, #tpu.memory_space<smem>>
    %5 = arith.index_cast %4 : i32 to index
    %c0_6 = arith.constant 0 : index
    %c0_7 = arith.constant 0 : index
    %6 = vector.load %arg1[%5, %c0_6, %c0_7] : memref<100x2x128xf32, #tpu.memory_space<vmem>>, vector<1x2x128xf32>
    %7 = vector.shape_cast %6 : vector<1x2x128xf32> to vector<2x128xf32>
    %c1_8 = arith.constant 1 : index
    %c0_9 = arith.constant 0 : index
    %8 = memref.load %arg0[%c1_8, %c0_9] : memref<2x8xi32, #tpu.memory_space<smem>>
    %9 = arith.index_cast %8 : i32 to index
    %c0_10 = arith.constant 0 : index
    %c0_11 = arith.constant 0 : index
    %10 = vector.load %arg1[%9, %c0_10, %c0_11] : memref<100x2x128xf32, #tpu.memory_space<vmem>>, vector<1x2x128xf32>
    %11 = vector.shape_cast %10 : vector<1x2x128xf32> to vector<2x128xf32>
    %12 = vector.extract_strided_slice %7 {offsets = [0, 0], sizes = [1, 128], strides = [1, 1]} : vector<2x128xf32> to vector<1x128xf32>
    %13 = vector.extract_strided_slice %11 {offsets = [0, 0], sizes = [1, 128], strides = [1, 1]} : vector<2x128xf32> to vector<1x128xf32>
    %14 = tpu.concatenate %12, %13 in 0 : vector<1x128xf32>, vector<1x128xf32> -> vector<2x128xf32>
    %15 = vector.extract_strided_slice %7 {offsets = [1, 0], sizes = [1, 128], strides = [1, 1]} : vector<2x128xf32> to vector<1x128xf32>
    %16 = vector.extract_strided_slice %11 {offsets = [1, 0], sizes = [1, 128], strides = [1, 1]} : vector<2x128xf32> to vector<1x128xf32>
    %17 = tpu.concatenate %15, %16 in 0 : vector<1x128xf32>, vector<1x128xf32> -> vector<2x128xf32>
    %c0_12 = arith.constant 0 : index
    %c1_13 = arith.constant 1 : index
    %18 = memref.load %arg0[%c0_12, %c1_13] : memref<2x8xi32, #tpu.memory_space<smem>>
    %19 = arith.index_cast %18 : i32 to index
    %c0_14 = arith.constant 0 : index
    %c0_15 = arith.constant 0 : index
    %20 = vector.load %arg1[%19, %c0_14, %c0_15] : memref<100x2x128xf32, #tpu.memory_space<vmem>>, vector<1x2x128xf32>
    %21 = vector.shape_cast %20 : vector<1x2x128xf32> to vector<2x128xf32>
    %c1_16 = arith.constant 1 : index
    %c1_17 = arith.constant 1 : index
    %22 = memref.load %arg0[%c1_16, %c1_17] : memref<2x8xi32, #tpu.memory_space<smem>>
    %23 = arith.index_cast %22 : i32 to index
    %c0_18 = arith.constant 0 : index
    %c0_19 = arith.constant 0 : index
    %24 = vector.load %arg1[%23, %c0_18, %c0_19] : memref<100x2x128xf32, #tpu.memory_space<vmem>>, vector<1x2x128xf32>
    %25 = vector.shape_cast %24 : vector<1x2x128xf32> to vector<2x128xf32>
    %26 = vector.extract_strided_slice %21 {offsets = [0, 0], sizes = [1, 128], strides = [1, 1]} : vector<2x128xf32> to vector<1x128xf32>
    %27 = vector.extract_strided_slice %25 {offsets = [0, 0], sizes = [1, 128], strides = [1, 1]} : vector<2x128xf32> to vector<1x128xf32>
    %28 = tpu.concatenate %26, %27 in 0 : vector<1x128xf32>, vector<1x128xf32> -> vector<2x128xf32>
    %29 = vector.extract_strided_slice %21 {offsets = [1, 0], sizes = [1, 128], strides = [1, 1]} : vector<2x128xf32> to vector<1x128xf32>
    %30 = vector.extract_strided_slice %25 {offsets = [1, 0], sizes = [1, 128], strides = [1, 1]} : vector<2x128xf32> to vector<1x128xf32>
    %31 = tpu.concatenate %29, %30 in 0 : vector<1x128xf32>, vector<1x128xf32> -> vector<2x128xf32>
    %c0_20 = arith.constant 0 : index
    %c2 = arith.constant 2 : index
    %32 = memref.load %arg0[%c0_20, %c2] : memref<2x8xi32, #tpu.memory_space<smem>>
    %33 = arith.index_cast %32 : i32 to index
    %c0_21 = arith.constant 0 : index
    %c0_22 = arith.constant 0 : index
    %34 = vector.load %arg1[%33, %c0_21, %c0_22] : memref<100x2x128xf32, #tpu.memory_space<vmem>>, vector<1x2x128xf32>
    %35 = vector.shape_cast %34 : vector<1x2x128xf32> to vector<2x128xf32>
    %c1_23 = arith.constant 1 : index
    %c2_24 = arith.constant 2 : index
    %36 = memref.load %arg0[%c1_23, %c2_24] : memref<2x8xi32, #tpu.memory_space<smem>>
    %37 = arith.index_cast %36 : i32 to index
    %c0_25 = arith.constant 0 : index
    %c0_26 = arith.constant 0 : index
    %38 = vector.load %arg1[%37, %c0_25, %c0_26] : memref<100x2x128xf32, #tpu.memory_space<vmem>>, vector<1x2x128xf32>
    %39 = vector.shape_cast %38 : vector<1x2x128xf32> to vector<2x128xf32>
    %40 = vector.extract_strided_slice %35 {offsets = [0, 0], sizes = [1, 128], strides = [1, 1]} : vector<2x128xf32> to vector<1x128xf32>
    %41 = vector.extract_strided_slice %39 {offsets = [0, 0], sizes = [1, 128], strides = [1, 1]} : vector<2x128xf32> to vector<1x128xf32>
    %42 = tpu.concatenate %40, %41 in 0 : vector<1x128xf32>, vector<1x128xf32> -> vector<2x128xf32>
    %43 = vector.extract_strided_slice %35 {offsets = [1, 0], sizes = [1, 128], strides = [1, 1]} : vector<2x128xf32> to vector<1x128xf32>
    %44 = vector.extract_strided_slice %39 {offsets = [1, 0], sizes = [1, 128], strides = [1, 1]} : vector<2x128xf32> to vector<1x128xf32>
    %45 = tpu.concatenate %43, %44 in 0 : vector<1x128xf32>, vector<1x128xf32> -> vector<2x128xf32>
    %c0_27 = arith.constant 0 : index
    %c3 = arith.constant 3 : index
    %46 = memref.load %arg0[%c0_27, %c3] : memref<2x8xi32, #tpu.memory_space<smem>>
    %47 = arith.index_cast %46 : i32 to index
    %c0_28 = arith.constant 0 : index
    %c0_29 = arith.constant 0 : index
    %48 = vector.load %arg1[%47, %c0_28, %c0_29] : memref<100x2x128xf32, #tpu.memory_space<vmem>>, vector<1x2x128xf32>
    %49 = vector.shape_cast %48 : vector<1x2x128xf32> to vector<2x128xf32>
    %c1_30 = arith.constant 1 : index
    %c3_31 = arith.constant 3 : index
    %50 = memref.load %arg0[%c1_30, %c3_31] : memref<2x8xi32, #tpu.memory_space<smem>>
    %51 = arith.index_cast %50 : i32 to index
    %c0_32 = arith.constant 0 : index
    %c0_33 = arith.constant 0 : index
    %52 = vector.load %arg1[%51, %c0_32, %c0_33] : memref<100x2x128xf32, #tpu.memory_space<vmem>>, vector<1x2x128xf32>
    %53 = vector.shape_cast %52 : vector<1x2x128xf32> to vector<2x128xf32>
    %54 = vector.extract_strided_slice %49 {offsets = [0, 0], sizes = [1, 128], strides = [1, 1]} : vector<2x128xf32> to vector<1x128xf32>
    %55 = vector.extract_strided_slice %53 {offsets = [0, 0], sizes = [1, 128], strides = [1, 1]} : vector<2x128xf32> to vector<1x128xf32>
    %56 = tpu.concatenate %54, %55 in 0 : vector<1x128xf32>, vector<1x128xf32> -> vector<2x128xf32>
    %57 = vector.extract_strided_slice %49 {offsets = [1, 0], sizes = [1, 128], strides = [1, 1]} : vector<2x128xf32> to vector<1x128xf32>
    %58 = vector.extract_strided_slice %53 {offsets = [1, 0], sizes = [1, 128], strides = [1, 1]} : vector<2x128xf32> to vector<1x128xf32>
    %59 = tpu.concatenate %57, %58 in 0 : vector<1x128xf32>, vector<1x128xf32> -> vector<2x128xf32>
    %c0_34 = arith.constant 0 : index
    %c4 = arith.constant 4 : index
    %60 = memref.load %arg0[%c0_34, %c4] : memref<2x8xi32, #tpu.memory_space<smem>>
    %61 = arith.index_cast %60 : i32 to index
    %c0_35 = arith.constant 0 : index
    %c0_36 = arith.constant 0 : index
    %62 = vector.load %arg1[%61, %c0_35, %c0_36] : memref<100x2x128xf32, #tpu.memory_space<vmem>>, vector<1x2x128xf32>
    %63 = vector.shape_cast %62 : vector<1x2x128xf32> to vector<2x128xf32>
    %c1_37 = arith.constant 1 : index
    %c4_38 = arith.constant 4 : index
    %64 = memref.load %arg0[%c1_37, %c4_38] : memref<2x8xi32, #tpu.memory_space<smem>>
    %65 = arith.index_cast %64 : i32 to index
    %c0_39 = arith.constant 0 : index
    %c0_40 = arith.constant 0 : index
    %66 = vector.load %arg1[%65, %c0_39, %c0_40] : memref<100x2x128xf32, #tpu.memory_space<vmem>>, vector<1x2x128xf32>
    %67 = vector.shape_cast %66 : vector<1x2x128xf32> to vector<2x128xf32>
    %68 = vector.extract_strided_slice %63 {offsets = [0, 0], sizes = [1, 128], strides = [1, 1]} : vector<2x128xf32> to vector<1x128xf32>
    %69 = vector.extract_strided_slice %67 {offsets = [0, 0], sizes = [1, 128], strides = [1, 1]} : vector<2x128xf32> to vector<1x128xf32>
    %70 = tpu.concatenate %68, %69 in 0 : vector<1x128xf32>, vector<1x128xf32> -> vector<2x128xf32>
    %71 = vector.extract_strided_slice %63 {offsets = [1, 0], sizes = [1, 128], strides = [1, 1]} : vector<2x128xf32> to vector<1x128xf32>
    %72 = vector.extract_strided_slice %67 {offsets = [1, 0], sizes = [1, 128], strides = [1, 1]} : vector<2x128xf32> to vector<1x128xf32>
    %73 = tpu.concatenate %71, %72 in 0 : vector<1x128xf32>, vector<1x128xf32> -> vector<2x128xf32>
    %c0_41 = arith.constant 0 : index
    %c5 = arith.constant 5 : index
    %74 = memref.load %arg0[%c0_41, %c5] : memref<2x8xi32, #tpu.memory_space<smem>>
    %75 = arith.index_cast %74 : i32 to index
    %c0_42 = arith.constant 0 : index
    %c0_43 = arith.constant 0 : index
    %76 = vector.load %arg1[%75, %c0_42, %c0_43] : memref<100x2x128xf32, #tpu.memory_space<vmem>>, vector<1x2x128xf32>
    %77 = vector.shape_cast %76 : vector<1x2x128xf32> to vector<2x128xf32>
    %c1_44 = arith.constant 1 : index
    %c5_45 = arith.constant 5 : index
    %78 = memref.load %arg0[%c1_44, %c5_45] : memref<2x8xi32, #tpu.memory_space<smem>>
    %79 = arith.index_cast %78 : i32 to index
    %c0_46 = arith.constant 0 : index
    %c0_47 = arith.constant 0 : index
    %80 = vector.load %arg1[%79, %c0_46, %c0_47] : memref<100x2x128xf32, #tpu.memory_space<vmem>>, vector<1x2x128xf32>
    %81 = vector.shape_cast %80 : vector<1x2x128xf32> to vector<2x128xf32>
    %82 = vector.extract_strided_slice %77 {offsets = [0, 0], sizes = [1, 128], strides = [1, 1]} : vector<2x128xf32> to vector<1x128xf32>
    %83 = vector.extract_strided_slice %81 {offsets = [0, 0], sizes = [1, 128], strides = [1, 1]} : vector<2x128xf32> to vector<1x128xf32>
    %84 = tpu.concatenate %82, %83 in 0 : vector<1x128xf32>, vector<1x128xf32> -> vector<2x128xf32>
    %85 = vector.extract_strided_slice %77 {offsets = [1, 0], sizes = [1, 128], strides = [1, 1]} : vector<2x128xf32> to vector<1x128xf32>
    %86 = vector.extract_strided_slice %81 {offsets = [1, 0], sizes = [1, 128], strides = [1, 1]} : vector<2x128xf32> to vector<1x128xf32>
    %87 = tpu.concatenate %85, %86 in 0 : vector<1x128xf32>, vector<1x128xf32> -> vector<2x128xf32>
    %c0_48 = arith.constant 0 : index
    %c6 = arith.constant 6 : index
    %88 = memref.load %arg0[%c0_48, %c6] : memref<2x8xi32, #tpu.memory_space<smem>>
    %89 = arith.index_cast %88 : i32 to index
    %c0_49 = arith.constant 0 : index
    %c0_50 = arith.constant 0 : index
    %90 = vector.load %arg1[%89, %c0_49, %c0_50] : memref<100x2x128xf32, #tpu.memory_space<vmem>>, vector<1x2x128xf32>
    %91 = vector.shape_cast %90 : vector<1x2x128xf32> to vector<2x128xf32>
    %c1_51 = arith.constant 1 : index
    %c6_52 = arith.constant 6 : index
    %92 = memref.load %arg0[%c1_51, %c6_52] : memref<2x8xi32, #tpu.memory_space<smem>>
    %93 = arith.index_cast %92 : i32 to index
    %c0_53 = arith.constant 0 : index
    %c0_54 = arith.constant 0 : index
    %94 = vector.load %arg1[%93, %c0_53, %c0_54] : memref<100x2x128xf32, #tpu.memory_space<vmem>>, vector<1x2x128xf32>
    %95 = vector.shape_cast %94 : vector<1x2x128xf32> to vector<2x128xf32>
    %96 = vector.extract_strided_slice %91 {offsets = [0, 0], sizes = [1, 128], strides = [1, 1]} : vector<2x128xf32> to vector<1x128xf32>
    %97 = vector.extract_strided_slice %95 {offsets = [0, 0], sizes = [1, 128], strides = [1, 1]} : vector<2x128xf32> to vector<1x128xf32>
    %98 = tpu.concatenate %96, %97 in 0 : vector<1x128xf32>, vector<1x128xf32> -> vector<2x128xf32>
    %99 = vector.extract_strided_slice %91 {offsets = [1, 0], sizes = [1, 128], strides = [1, 1]} : vector<2x128xf32> to vector<1x128xf32>
    %100 = vector.extract_strided_slice %95 {offsets = [1, 0], sizes = [1, 128], strides = [1, 1]} : vector<2x128xf32> to vector<1x128xf32>
    %101 = tpu.concatenate %99, %100 in 0 : vector<1x128xf32>, vector<1x128xf32> -> vector<2x128xf32>
    %c0_55 = arith.constant 0 : index
    %c7 = arith.constant 7 : index
    %102 = memref.load %arg0[%c0_55, %c7] : memref<2x8xi32, #tpu.memory_space<smem>>
    %103 = arith.index_cast %102 : i32 to index
    %c0_56 = arith.constant 0 : index
    %c0_57 = arith.constant 0 : index
    %104 = vector.load %arg1[%103, %c0_56, %c0_57] : memref<100x2x128xf32, #tpu.memory_space<vmem>>, vector<1x2x128xf32>
    %105 = vector.shape_cast %104 : vector<1x2x128xf32> to vector<2x128xf32>
    %c1_58 = arith.constant 1 : index
    %c7_59 = arith.constant 7 : index
    %106 = memref.load %arg0[%c1_58, %c7_59] : memref<2x8xi32, #tpu.memory_space<smem>>
    %107 = arith.index_cast %106 : i32 to index
    %c0_60 = arith.constant 0 : index
    %c0_61 = arith.constant 0 : index
    %108 = vector.load %arg1[%107, %c0_60, %c0_61] : memref<100x2x128xf32, #tpu.memory_space<vmem>>, vector<1x2x128xf32>
    %109 = vector.shape_cast %108 : vector<1x2x128xf32> to vector<2x128xf32>
    %110 = vector.extract_strided_slice %105 {offsets = [0, 0], sizes = [1, 128], strides = [1, 1]} : vector<2x128xf32> to vector<1x128xf32>
    %111 = vector.extract_strided_slice %109 {offsets = [0, 0], sizes = [1, 128], strides = [1, 1]} : vector<2x128xf32> to vector<1x128xf32>
    %112 = tpu.concatenate %110, %111 in 0 : vector<1x128xf32>, vector<1x128xf32> -> vector<2x128xf32>
    %113 = vector.extract_strided_slice %105 {offsets = [1, 0], sizes = [1, 128], strides = [1, 1]} : vector<2x128xf32> to vector<1x128xf32>
    %114 = vector.extract_strided_slice %109 {offsets = [1, 0], sizes = [1, 128], strides = [1, 1]} : vector<2x128xf32> to vector<1x128xf32>
    %115 = tpu.concatenate %113, %114 in 0 : vector<1x128xf32>, vector<1x128xf32> -> vector<2x128xf32>
    %cst = arith.constant 0.000000e+00 : f32
    %116 = vector.broadcast %cst : f32 to vector<2x32xf32>
    %cst_62 = arith.constant 0.000000e+00 : f32
    %117 = vector.broadcast %cst_62 : f32 to vector<2x32xf32>
    %cst_63 = arith.constant 0.000000e+00 : f32
    %118 = vector.broadcast %cst_63 : f32 to vector<2x32xf32>
    %cst_64 = arith.constant 0.000000e+00 : f32
    %119 = vector.broadcast %cst_64 : f32 to vector<2x32xf32>
    %cst_65 = arith.constant dense<0.000000e+00> : vector<2x128xf32>
    %120 = tpu.matmul %116, %1, %cst_65 {dimension_numbers = #tpu.dot_dimension_numbers<[1], [0], [0], [1], [0, 0, 1, 1], [], []>, precision = #tpu.contract_precision<fp32>} : vector<2x32xf32>, vector<32x128xf32>, vector<2x128xf32> -> vector<2x128xf32>
    %121 = arith.addf %14, %120 : vector<2x128xf32>
    %cst_66 = arith.constant dense<0.000000e+00> : vector<2x128xf32>
    %122 = tpu.matmul %118, %3, %cst_66 {dimension_numbers = #tpu.dot_dimension_numbers<[1], [0], [0], [1], [0, 0, 1, 1], [], []>, precision = #tpu.contract_precision<fp32>} : vector<2x32xf32>, vector<32x128xf32>, vector<2x128xf32> -> vector<2x128xf32>
    %123 = arith.addf %115, %122 : vector<2x128xf32>
    %cst_67 = arith.constant 5.000000e-01 : f32
    %124 = vector.broadcast %cst_67 : f32 to vector<2x128xf32>
    %125 = arith.mulf %124, %121 : vector<2x128xf32>
    %126 = math.tanh %125 : vector<2x128xf32>
    %cst_68 = arith.constant 5.000000e-01 : f32
    %127 = vector.broadcast %cst_68 : f32 to vector<2x128xf32>
    %128 = arith.mulf %127, %126 : vector<2x128xf32>
    %cst_69 = arith.constant 5.000000e-01 : f32
    %129 = vector.broadcast %cst_69 : f32 to vector<2x128xf32>
    %130 = arith.addf %128, %129 : vector<2x128xf32>
    %131 = math.tanh %121 : vector<2x128xf32>
    %cst_70 = arith.constant 5.000000e-01 : f32
    %132 = vector.broadcast %cst_70 : f32 to vector<2x128xf32>
    %133 = arith.mulf %132, %123 : vector<2x128xf32>
    %134 = math.tanh %133 : vector<2x128xf32>
    %cst_71 = arith.constant 5.000000e-01 : f32
    %135 = vector.broadcast %cst_71 : f32 to vector<2x128xf32>
    %136 = arith.mulf %135, %134 : vector<2x128xf32>
    %cst_72 = arith.constant 5.000000e-01 : f32
    %137 = vector.broadcast %cst_72 : f32 to vector<2x128xf32>
    %138 = arith.addf %136, %137 : vector<2x128xf32>
    %139 = math.tanh %123 : vector<2x128xf32>
    %140 = vector.extract_strided_slice %130 {offsets = [0, 32], sizes = [2, 32], strides = [1, 1]} : vector<2x128xf32> to vector<2x32xf32>
    %141 = arith.mulf %140, %117 : vector<2x32xf32>
    %142 = vector.extract_strided_slice %130 {offsets = [0, 0], sizes = [2, 32], strides = [1, 1]} : vector<2x128xf32> to vector<2x32xf32>
    %143 = vector.extract_strided_slice %131 {offsets = [0, 64], sizes = [2, 32], strides = [1, 1]} : vector<2x128xf32> to vector<2x32xf32>
    %144 = arith.mulf %142, %143 : vector<2x32xf32>
    %145 = arith.addf %141, %144 : vector<2x32xf32>
    %146 = vector.extract_strided_slice %138 {offsets = [0, 32], sizes = [2, 32], strides = [1, 1]} : vector<2x128xf32> to vector<2x32xf32>
    %147 = arith.mulf %146, %119 : vector<2x32xf32>
    %148 = vector.extract_strided_slice %138 {offsets = [0, 0], sizes = [2, 32], strides = [1, 1]} : vector<2x128xf32> to vector<2x32xf32>
    %149 = vector.extract_strided_slice %139 {offsets = [0, 64], sizes = [2, 32], strides = [1, 1]} : vector<2x128xf32> to vector<2x32xf32>
    %150 = arith.mulf %148, %149 : vector<2x32xf32>
    %151 = arith.addf %147, %150 : vector<2x32xf32>
    %152 = vector.extract_strided_slice %130 {offsets = [0, 96], sizes = [2, 32], strides = [1, 1]} : vector<2x128xf32> to vector<2x32xf32>
    %153 = math.tanh %145 : vector<2x32xf32>
    %154 = arith.mulf %152, %153 : vector<2x32xf32>
    %155 = vector.extract_strided_slice %138 {offsets = [0, 96], sizes = [2, 32], strides = [1, 1]} : vector<2x128xf32> to vector<2x32xf32>
    %156 = math.tanh %151 : vector<2x32xf32>
    %157 = arith.mulf %155, %156 : vector<2x32xf32>
    %c0_73 = arith.constant 0 : index
    %c0_74 = arith.constant 0 : index
    %c0_75 = arith.constant 0 : index
    %158 = vector.load %arg3[%c0_73, %c0_74, %c0_75] : memref<8x2x64xf32, #tpu.memory_space<vmem>>, vector<1x2x32xf32>
    %159 = vector.shape_cast %158 : vector<1x2x32xf32> to vector<2x32xf32>
    %160 = vector.shape_cast %154 : vector<2x32xf32> to vector<1x2x32xf32>
    tpu.vector_store %arg3[%c0_73, %c0_74, %c0_75], %160 {strides = array<i32>} : memref<8x2x64xf32, #tpu.memory_space<vmem>>, vector<1x2x32xf32>,
    %c7_76 = arith.constant 7 : index
    %c0_77 = arith.constant 0 : index
    %c32 = arith.constant 32 : index
    %161 = vector.load %arg3[%c7_76, %c0_77, %c32] : memref<8x2x64xf32, #tpu.memory_space<vmem>>, vector<1x2x32xf32>
    %162 = vector.shape_cast %161 : vector<1x2x32xf32> to vector<2x32xf32>
    %163 = vector.shape_cast %157 : vector<2x32xf32> to vector<1x2x32xf32>
    tpu.vector_store %arg3[%c7_76, %c0_77, %c32], %163 {strides = array<i32>} : memref<8x2x64xf32, #tpu.memory_space<vmem>>, vector<1x2x32xf32>,
    %cst_78 = arith.constant dense<0.000000e+00> : vector<2x128xf32>
    %164 = tpu.matmul %154, %1, %cst_78 {dimension_numbers = #tpu.dot_dimension_numbers<[1], [0], [0], [1], [0, 0, 1, 1], [], []>, precision = #tpu.contract_precision<fp32>} : vector<2x32xf32>, vector<32x128xf32>, vector<2x128xf32> -> vector<2x128xf32>
    %165 = arith.addf %28, %164 : vector<2x128xf32>
    %cst_79 = arith.constant dense<0.000000e+00> : vector<2x128xf32>
    %166 = tpu.matmul %157, %3, %cst_79 {dimension_numbers = #tpu.dot_dimension_numbers<[1], [0], [0], [1], [0, 0, 1, 1], [], []>, precision = #tpu.contract_precision<fp32>} : vector<2x32xf32>, vector<32x128xf32>, vector<2x128xf32> -> vector<2x128xf32>
    %167 = arith.addf %101, %166 : vector<2x128xf32>
    %cst_80 = arith.constant 5.000000e-01 : f32
    %168 = vector.broadcast %cst_80 : f32 to vector<2x128xf32>
    %169 = arith.mulf %168, %165 : vector<2x128xf32>
    %170 = math.tanh %169 : vector<2x128xf32>
    %cst_81 = arith.constant 5.000000e-01 : f32
    %171 = vector.broadcast %cst_81 : f32 to vector<2x128xf32>
    %172 = arith.mulf %171, %170 : vector<2x128xf32>
    %cst_82 = arith.constant 5.000000e-01 : f32
    %173 = vector.broadcast %cst_82 : f32 to vector<2x128xf32>
    %174 = arith.addf %172, %173 : vector<2x128xf32>
    %175 = math.tanh %165 : vector<2x128xf32>
    %cst_83 = arith.constant 5.000000e-01 : f32
    %176 = vector.broadcast %cst_83 : f32 to vector<2x128xf32>
    %177 = arith.mulf %176, %167 : vector<2x128xf32>
    %178 = math.tanh %177 : vector<2x128xf32>
    %cst_84 = arith.constant 5.000000e-01 : f32
    %179 = vector.broadcast %cst_84 : f32 to vector<2x128xf32>
    %180 = arith.mulf %179, %178 : vector<2x128xf32>
    %cst_85 = arith.constant 5.000000e-01 : f32
    %181 = vector.broadcast %cst_85 : f32 to vector<2x128xf32>
    %182 = arith.addf %180, %181 : vector<2x128xf32>
    %183 = math.tanh %167 : vector<2x128xf32>
    %184 = vector.extract_strided_slice %174 {offsets = [0, 32], sizes = [2, 32], strides = [1, 1]} : vector<2x128xf32> to vector<2x32xf32>
    %185 = arith.mulf %184, %145 : vector<2x32xf32>
    %186 = vector.extract_strided_slice %174 {offsets = [0, 0], sizes = [2, 32], strides = [1, 1]} : vector<2x128xf32> to vector<2x32xf32>
    %187 = vector.extract_strided_slice %175 {offsets = [0, 64], sizes = [2, 32], strides = [1, 1]} : vector<2x128xf32> to vector<2x32xf32>
    %188 = arith.mulf %186, %187 : vector<2x32xf32>
    %189 = arith.addf %185, %188 : vector<2x32xf32>
    %190 = vector.extract_strided_slice %182 {offsets = [0, 32], sizes = [2, 32], strides = [1, 1]} : vector<2x128xf32> to vector<2x32xf32>
    %191 = arith.mulf %190, %151 : vector<2x32xf32>
    %192 = vector.extract_strided_slice %182 {offsets = [0, 0], sizes = [2, 32], strides = [1, 1]} : vector<2x128xf32> to vector<2x32xf32>
    %193 = vector.extract_strided_slice %183 {offsets = [0, 64], sizes = [2, 32], strides = [1, 1]} : vector<2x128xf32> to vector<2x32xf32>
    %194 = arith.mulf %192, %193 : vector<2x32xf32>
    %195 = arith.addf %191, %194 : vector<2x32xf32>
    %196 = vector.extract_strided_slice %174 {offsets = [0, 96], sizes = [2, 32], strides = [1, 1]} : vector<2x128xf32> to vector<2x32xf32>
    %197 = math.tanh %189 : vector<2x32xf32>
    %198 = arith.mulf %196, %197 : vector<2x32xf32>
    %199 = vector.extract_strided_slice %182 {offsets = [0, 96], sizes = [2, 32], strides = [1, 1]} : vector<2x128xf32> to vector<2x32xf32>
    %200 = math.tanh %195 : vector<2x32xf32>
    %201 = arith.mulf %199, %200 : vector<2x32xf32>
    %c1_86 = arith.constant 1 : index
    %c0_87 = arith.constant 0 : index
    %c0_88 = arith.constant 0 : index
    %202 = vector.load %arg3[%c1_86, %c0_87, %c0_88] : memref<8x2x64xf32, #tpu.memory_space<vmem>>, vector<1x2x32xf32>
    %203 = vector.shape_cast %202 : vector<1x2x32xf32> to vector<2x32xf32>
    %204 = vector.shape_cast %198 : vector<2x32xf32> to vector<1x2x32xf32>
    tpu.vector_store %arg3[%c1_86, %c0_87, %c0_88], %204 {strides = array<i32>} : memref<8x2x64xf32, #tpu.memory_space<vmem>>, vector<1x2x32xf32>,
    %c6_89 = arith.constant 6 : index
    %c0_90 = arith.constant 0 : index
    %c32_91 = arith.constant 32 : index
    %205 = vector.load %arg3[%c6_89, %c0_90, %c32_91] : memref<8x2x64xf32, #tpu.memory_space<vmem>>, vector<1x2x32xf32>
    %206 = vector.shape_cast %205 : vector<1x2x32xf32> to vector<2x32xf32>
    %207 = vector.shape_cast %201 : vector<2x32xf32> to vector<1x2x32xf32>
    tpu.vector_store %arg3[%c6_89, %c0_90, %c32_91], %207 {strides = array<i32>} : memref<8x2x64xf32, #tpu.memory_space<vmem>>, vector<1x2x32xf32>,
    %cst_92 = arith.constant dense<0.000000e+00> : vector<2x128xf32>
    %208 = tpu.matmul %198, %1, %cst_92 {dimension_numbers = #tpu.dot_dimension_numbers<[1], [0], [0], [1], [0, 0, 1, 1], [], []>, precision = #tpu.contract_precision<fp32>} : vector<2x32xf32>, vector<32x128xf32>, vector<2x128xf32> -> vector<2x128xf32>
    %209 = arith.addf %42, %208 : vector<2x128xf32>
    %cst_93 = arith.constant dense<0.000000e+00> : vector<2x128xf32>
    %210 = tpu.matmul %201, %3, %cst_93 {dimension_numbers = #tpu.dot_dimension_numbers<[1], [0], [0], [1], [0, 0, 1, 1], [], []>, precision = #tpu.contract_precision<fp32>} : vector<2x32xf32>, vector<32x128xf32>, vector<2x128xf32> -> vector<2x128xf32>
    %211 = arith.addf %87, %210 : vector<2x128xf32>
    %cst_94 = arith.constant 5.000000e-01 : f32
    %212 = vector.broadcast %cst_94 : f32 to vector<2x128xf32>
    %213 = arith.mulf %212, %209 : vector<2x128xf32>
    %214 = math.tanh %213 : vector<2x128xf32>
    %cst_95 = arith.constant 5.000000e-01 : f32
    %215 = vector.broadcast %cst_95 : f32 to vector<2x128xf32>
    %216 = arith.mulf %215, %214 : vector<2x128xf32>
    %cst_96 = arith.constant 5.000000e-01 : f32
    %217 = vector.broadcast %cst_96 : f32 to vector<2x128xf32>
    %218 = arith.addf %216, %217 : vector<2x128xf32>
    %219 = math.tanh %209 : vector<2x128xf32>
    %cst_97 = arith.constant 5.000000e-01 : f32
    %220 = vector.broadcast %cst_97 : f32 to vector<2x128xf32>
    %221 = arith.mulf %220, %211 : vector<2x128xf32>
    %222 = math.tanh %221 : vector<2x128xf32>
    %cst_98 = arith.constant 5.000000e-01 : f32
    %223 = vector.broadcast %cst_98 : f32 to vector<2x128xf32>
    %224 = arith.mulf %223, %222 : vector<2x128xf32>
    %cst_99 = arith.constant 5.000000e-01 : f32
    %225 = vector.broadcast %cst_99 : f32 to vector<2x128xf32>
    %226 = arith.addf %224, %225 : vector<2x128xf32>
    %227 = math.tanh %211 : vector<2x128xf32>
    %228 = vector.extract_strided_slice %218 {offsets = [0, 32], sizes = [2, 32], strides = [1, 1]} : vector<2x128xf32> to vector<2x32xf32>
    %229 = arith.mulf %228, %189 : vector<2x32xf32>
    %230 = vector.extract_strided_slice %218 {offsets = [0, 0], sizes = [2, 32], strides = [1, 1]} : vector<2x128xf32> to vector<2x32xf32>
    %231 = vector.extract_strided_slice %219 {offsets = [0, 64], sizes = [2, 32], strides = [1, 1]} : vector<2x128xf32> to vector<2x32xf32>
    %232 = arith.mulf %230, %231 : vector<2x32xf32>
    %233 = arith.addf %229, %232 : vector<2x32xf32>
    %234 = vector.extract_strided_slice %226 {offsets = [0, 32], sizes = [2, 32], strides = [1, 1]} : vector<2x128xf32> to vector<2x32xf32>
    %235 = arith.mulf %234, %195 : vector<2x32xf32>
    %236 = vector.extract_strided_slice %226 {offsets = [0, 0], sizes = [2, 32], strides = [1, 1]} : vector<2x128xf32> to vector<2x32xf32>
    %237 = vector.extract_strided_slice %227 {offsets = [0, 64], sizes = [2, 32], strides = [1, 1]} : vector<2x128xf32> to vector<2x32xf32>
    %238 = arith.mulf %236, %237 : vector<2x32xf32>
    %239 = arith.addf %235, %238 : vector<2x32xf32>
    %240 = vector.extract_strided_slice %218 {offsets = [0, 96], sizes = [2, 32], strides = [1, 1]} : vector<2x128xf32> to vector<2x32xf32>
    %241 = math.tanh %233 : vector<2x32xf32>
    %242 = arith.mulf %240, %241 : vector<2x32xf32>
    %243 = vector.extract_strided_slice %226 {offsets = [0, 96], sizes = [2, 32], strides = [1, 1]} : vector<2x128xf32> to vector<2x32xf32>
    %244 = math.tanh %239 : vector<2x32xf32>
    %245 = arith.mulf %243, %244 : vector<2x32xf32>
    %c2_100 = arith.constant 2 : index
    %c0_101 = arith.constant 0 : index
    %c0_102 = arith.constant 0 : index
    %246 = vector.load %arg3[%c2_100, %c0_101, %c0_102] : memref<8x2x64xf32, #tpu.memory_space<vmem>>, vector<1x2x32xf32>
    %247 = vector.shape_cast %246 : vector<1x2x32xf32> to vector<2x32xf32>
    %248 = vector.shape_cast %242 : vector<2x32xf32> to vector<1x2x32xf32>
    tpu.vector_store %arg3[%c2_100, %c0_101, %c0_102], %248 {strides = array<i32>} : memref<8x2x64xf32, #tpu.memory_space<vmem>>, vector<1x2x32xf32>,
    %c5_103 = arith.constant 5 : index
    %c0_104 = arith.constant 0 : index
    %c32_105 = arith.constant 32 : index
    %249 = vector.load %arg3[%c5_103, %c0_104, %c32_105] : memref<8x2x64xf32, #tpu.memory_space<vmem>>, vector<1x2x32xf32>
    %250 = vector.shape_cast %249 : vector<1x2x32xf32> to vector<2x32xf32>
    %251 = vector.shape_cast %245 : vector<2x32xf32> to vector<1x2x32xf32>
    tpu.vector_store %arg3[%c5_103, %c0_104, %c32_105], %251 {strides = array<i32>} : memref<8x2x64xf32, #tpu.memory_space<vmem>>, vector<1x2x32xf32>,
    %cst_106 = arith.constant dense<0.000000e+00> : vector<2x128xf32>
    %252 = tpu.matmul %242, %1, %cst_106 {dimension_numbers = #tpu.dot_dimension_numbers<[1], [0], [0], [1], [0, 0, 1, 1], [], []>, precision = #tpu.contract_precision<fp32>} : vector<2x32xf32>, vector<32x128xf32>, vector<2x128xf32> -> vector<2x128xf32>
    %253 = arith.addf %56, %252 : vector<2x128xf32>
    %cst_107 = arith.constant dense<0.000000e+00> : vector<2x128xf32>
    %254 = tpu.matmul %245, %3, %cst_107 {dimension_numbers = #tpu.dot_dimension_numbers<[1], [0], [0], [1], [0, 0, 1, 1], [], []>, precision = #tpu.contract_precision<fp32>} : vector<2x32xf32>, vector<32x128xf32>, vector<2x128xf32> -> vector<2x128xf32>
    %255 = arith.addf %73, %254 : vector<2x128xf32>
    %cst_108 = arith.constant 5.000000e-01 : f32
    %256 = vector.broadcast %cst_108 : f32 to vector<2x128xf32>
    %257 = arith.mulf %256, %253 : vector<2x128xf32>
    %258 = math.tanh %257 : vector<2x128xf32>
    %cst_109 = arith.constant 5.000000e-01 : f32
    %259 = vector.broadcast %cst_109 : f32 to vector<2x128xf32>
    %260 = arith.mulf %259, %258 : vector<2x128xf32>
    %cst_110 = arith.constant 5.000000e-01 : f32
    %261 = vector.broadcast %cst_110 : f32 to vector<2x128xf32>
    %262 = arith.addf %260, %261 : vector<2x128xf32>
    %263 = math.tanh %253 : vector<2x128xf32>
    %cst_111 = arith.constant 5.000000e-01 : f32
    %264 = vector.broadcast %cst_111 : f32 to vector<2x128xf32>
    %265 = arith.mulf %264, %255 : vector<2x128xf32>
    %266 = math.tanh %265 : vector<2x128xf32>
    %cst_112 = arith.constant 5.000000e-01 : f32
    %267 = vector.broadcast %cst_112 : f32 to vector<2x128xf32>
    %268 = arith.mulf %267, %266 : vector<2x128xf32>
    %cst_113 = arith.constant 5.000000e-01 : f32
    %269 = vector.broadcast %cst_113 : f32 to vector<2x128xf32>
    %270 = arith.addf %268, %269 : vector<2x128xf32>
    %271 = math.tanh %255 : vector<2x128xf32>
    %272 = vector.extract_strided_slice %262 {offsets = [0, 32], sizes = [2, 32], strides = [1, 1]} : vector<2x128xf32> to vector<2x32xf32>
    %273 = arith.mulf %272, %233 : vector<2x32xf32>
    %274 = vector.extract_strided_slice %262 {offsets = [0, 0], sizes = [2, 32], strides = [1, 1]} : vector<2x128xf32> to vector<2x32xf32>
    %275 = vector.extract_strided_slice %263 {offsets = [0, 64], sizes = [2, 32], strides = [1, 1]} : vector<2x128xf32> to vector<2x32xf32>
    %276 = arith.mulf %274, %275 : vector<2x32xf32>
    %277 = arith.addf %273, %276 : vector<2x32xf32>
    %278 = vector.extract_strided_slice %270 {offsets = [0, 32], sizes = [2, 32], strides = [1, 1]} : vector<2x128xf32> to vector<2x32xf32>
    %279 = arith.mulf %278, %239 : vector<2x32xf32>
    %280 = vector.extract_strided_slice %270 {offsets = [0, 0], sizes = [2, 32], strides = [1, 1]} : vector<2x128xf32> to vector<2x32xf32>
    %281 = vector.extract_strided_slice %271 {offsets = [0, 64], sizes = [2, 32], strides = [1, 1]} : vector<2x128xf32> to vector<2x32xf32>
    %282 = arith.mulf %280, %281 : vector<2x32xf32>
    %283 = arith.addf %279, %282 : vector<2x32xf32>
    %284 = vector.extract_strided_slice %262 {offsets = [0, 96], sizes = [2, 32], strides = [1, 1]} : vector<2x128xf32> to vector<2x32xf32>
    %285 = math.tanh %277 : vector<2x32xf32>
    %286 = arith.mulf %284, %285 : vector<2x32xf32>
    %287 = vector.extract_strided_slice %270 {offsets = [0, 96], sizes = [2, 32], strides = [1, 1]} : vector<2x128xf32> to vector<2x32xf32>
    %288 = math.tanh %283 : vector<2x32xf32>
    %289 = arith.mulf %287, %288 : vector<2x32xf32>
    %c3_114 = arith.constant 3 : index
    %c0_115 = arith.constant 0 : index
    %c0_116 = arith.constant 0 : index
    %290 = vector.load %arg3[%c3_114, %c0_115, %c0_116] : memref<8x2x64xf32, #tpu.memory_space<vmem>>, vector<1x2x32xf32>
    %291 = vector.shape_cast %290 : vector<1x2x32xf32> to vector<2x32xf32>
    %292 = vector.shape_cast %286 : vector<2x32xf32> to vector<1x2x32xf32>
    tpu.vector_store %arg3[%c3_114, %c0_115, %c0_116], %292 {strides = array<i32>} : memref<8x2x64xf32, #tpu.memory_space<vmem>>, vector<1x2x32xf32>,
    %c4_117 = arith.constant 4 : index
    %c0_118 = arith.constant 0 : index
    %c32_119 = arith.constant 32 : index
    %293 = vector.load %arg3[%c4_117, %c0_118, %c32_119] : memref<8x2x64xf32, #tpu.memory_space<vmem>>, vector<1x2x32xf32>
    %294 = vector.shape_cast %293 : vector<1x2x32xf32> to vector<2x32xf32>
    %295 = vector.shape_cast %289 : vector<2x32xf32> to vector<1x2x32xf32>
    tpu.vector_store %arg3[%c4_117, %c0_118, %c32_119], %295 {strides = array<i32>} : memref<8x2x64xf32, #tpu.memory_space<vmem>>, vector<1x2x32xf32>,
    %cst_120 = arith.constant dense<0.000000e+00> : vector<2x128xf32>
    %296 = tpu.matmul %286, %1, %cst_120 {dimension_numbers = #tpu.dot_dimension_numbers<[1], [0], [0], [1], [0, 0, 1, 1], [], []>, precision = #tpu.contract_precision<fp32>} : vector<2x32xf32>, vector<32x128xf32>, vector<2x128xf32> -> vector<2x128xf32>
    %297 = arith.addf %70, %296 : vector<2x128xf32>
    %cst_121 = arith.constant dense<0.000000e+00> : vector<2x128xf32>
    %298 = tpu.matmul %289, %3, %cst_121 {dimension_numbers = #tpu.dot_dimension_numbers<[1], [0], [0], [1], [0, 0, 1, 1], [], []>, precision = #tpu.contract_precision<fp32>} : vector<2x32xf32>, vector<32x128xf32>, vector<2x128xf32> -> vector<2x128xf32>
    %299 = arith.addf %59, %298 : vector<2x128xf32>
    %cst_122 = arith.constant 5.000000e-01 : f32
    %300 = vector.broadcast %cst_122 : f32 to vector<2x128xf32>
    %301 = arith.mulf %300, %297 : vector<2x128xf32>
    %302 = math.tanh %301 : vector<2x128xf32>
    %cst_123 = arith.constant 5.000000e-01 : f32
    %303 = vector.broadcast %cst_123 : f32 to vector<2x128xf32>
    %304 = arith.mulf %303, %302 : vector<2x128xf32>
    %cst_124 = arith.constant 5.000000e-01 : f32
    %305 = vector.broadcast %cst_124 : f32 to vector<2x128xf32>
    %306 = arith.addf %304, %305 : vector<2x128xf32>
    %307 = math.tanh %297 : vector<2x128xf32>
    %cst_125 = arith.constant 5.000000e-01 : f32
    %308 = vector.broadcast %cst_125 : f32 to vector<2x128xf32>
    %309 = arith.mulf %308, %299 : vector<2x128xf32>
    %310 = math.tanh %309 : vector<2x128xf32>
    %cst_126 = arith.constant 5.000000e-01 : f32
    %311 = vector.broadcast %cst_126 : f32 to vector<2x128xf32>
    %312 = arith.mulf %311, %310 : vector<2x128xf32>
    %cst_127 = arith.constant 5.000000e-01 : f32
    %313 = vector.broadcast %cst_127 : f32 to vector<2x128xf32>
    %314 = arith.addf %312, %313 : vector<2x128xf32>
    %315 = math.tanh %299 : vector<2x128xf32>
    %316 = vector.extract_strided_slice %306 {offsets = [0, 32], sizes = [2, 32], strides = [1, 1]} : vector<2x128xf32> to vector<2x32xf32>
    %317 = arith.mulf %316, %277 : vector<2x32xf32>
    %318 = vector.extract_strided_slice %306 {offsets = [0, 0], sizes = [2, 32], strides = [1, 1]} : vector<2x128xf32> to vector<2x32xf32>
    %319 = vector.extract_strided_slice %307 {offsets = [0, 64], sizes = [2, 32], strides = [1, 1]} : vector<2x128xf32> to vector<2x32xf32>
    %320 = arith.mulf %318, %319 : vector<2x32xf32>
    %321 = arith.addf %317, %320 : vector<2x32xf32>
    %322 = vector.extract_strided_slice %314 {offsets = [0, 32], sizes = [2, 32], strides = [1, 1]} : vector<2x128xf32> to vector<2x32xf32>
    %323 = arith.mulf %322, %283 : vector<2x32xf32>
    %324 = vector.extract_strided_slice %314 {offsets = [0, 0], sizes = [2, 32], strides = [1, 1]} : vector<2x128xf32> to vector<2x32xf32>
    %325 = vector.extract_strided_slice %315 {offsets = [0, 64], sizes = [2, 32], strides = [1, 1]} : vector<2x128xf32> to vector<2x32xf32>
    %326 = arith.mulf %324, %325 : vector<2x32xf32>
    %327 = arith.addf %323, %326 : vector<2x32xf32>
    %328 = vector.extract_strided_slice %306 {offsets = [0, 96], sizes = [2, 32], strides = [1, 1]} : vector<2x128xf32> to vector<2x32xf32>
    %329 = math.tanh %321 : vector<2x32xf32>
    %330 = arith.mulf %328, %329 : vector<2x32xf32>
    %331 = vector.extract_strided_slice %314 {offsets = [0, 96], sizes = [2, 32], strides = [1, 1]} : vector<2x128xf32> to vector<2x32xf32>
    %332 = math.tanh %327 : vector<2x32xf32>
    %333 = arith.mulf %331, %332 : vector<2x32xf32>
    %c4_128 = arith.constant 4 : index
    %c0_129 = arith.constant 0 : index
    %c0_130 = arith.constant 0 : index
    %334 = vector.load %arg3[%c4_128, %c0_129, %c0_130] : memref<8x2x64xf32, #tpu.memory_space<vmem>>, vector<1x2x32xf32>
    %335 = vector.shape_cast %334 : vector<1x2x32xf32> to vector<2x32xf32>
    %336 = vector.shape_cast %330 : vector<2x32xf32> to vector<1x2x32xf32>
    tpu.vector_store %arg3[%c4_128, %c0_129, %c0_130], %336 {strides = array<i32>} : memref<8x2x64xf32, #tpu.memory_space<vmem>>, vector<1x2x32xf32>,
    %c3_131 = arith.constant 3 : index
    %c0_132 = arith.constant 0 : index
    %c32_133 = arith.constant 32 : index
    %337 = vector.load %arg3[%c3_131, %c0_132, %c32_133] : memref<8x2x64xf32, #tpu.memory_space<vmem>>, vector<1x2x32xf32>
    %338 = vector.shape_cast %337 : vector<1x2x32xf32> to vector<2x32xf32>
    %339 = vector.shape_cast %333 : vector<2x32xf32> to vector<1x2x32xf32>
    tpu.vector_store %arg3[%c3_131, %c0_132, %c32_133], %339 {strides = array<i32>} : memref<8x2x64xf32, #tpu.memory_space<vmem>>, vector<1x2x32xf32>,
    %cst_134 = arith.constant dense<0.000000e+00> : vector<2x128xf32>
    %340 = tpu.matmul %330, %1, %cst_134 {dimension_numbers = #tpu.dot_dimension_numbers<[1], [0], [0], [1], [0, 0, 1, 1], [], []>, precision = #tpu.contract_precision<fp32>} : vector<2x32xf32>, vector<32x128xf32>, vector<2x128xf32> -> vector<2x128xf32>
    %341 = arith.addf %84, %340 : vector<2x128xf32>
    %cst_135 = arith.constant dense<0.000000e+00> : vector<2x128xf32>
    %342 = tpu.matmul %333, %3, %cst_135 {dimension_numbers = #tpu.dot_dimension_numbers<[1], [0], [0], [1], [0, 0, 1, 1], [], []>, precision = #tpu.contract_precision<fp32>} : vector<2x32xf32>, vector<32x128xf32>, vector<2x128xf32> -> vector<2x128xf32>
    %343 = arith.addf %45, %342 : vector<2x128xf32>
    %cst_136 = arith.constant 5.000000e-01 : f32
    %344 = vector.broadcast %cst_136 : f32 to vector<2x128xf32>
    %345 = arith.mulf %344, %341 : vector<2x128xf32>
    %346 = math.tanh %345 : vector<2x128xf32>
    %cst_137 = arith.constant 5.000000e-01 : f32
    %347 = vector.broadcast %cst_137 : f32 to vector<2x128xf32>
    %348 = arith.mulf %347, %346 : vector<2x128xf32>
    %cst_138 = arith.constant 5.000000e-01 : f32
    %349 = vector.broadcast %cst_138 : f32 to vector<2x128xf32>
    %350 = arith.addf %348, %349 : vector<2x128xf32>
    %351 = math.tanh %341 : vector<2x128xf32>
    %cst_139 = arith.constant 5.000000e-01 : f32
    %352 = vector.broadcast %cst_139 : f32 to vector<2x128xf32>
    %353 = arith.mulf %352, %343 : vector<2x128xf32>
    %354 = math.tanh %353 : vector<2x128xf32>
    %cst_140 = arith.constant 5.000000e-01 : f32
    %355 = vector.broadcast %cst_140 : f32 to vector<2x128xf32>
    %356 = arith.mulf %355, %354 : vector<2x128xf32>
    %cst_141 = arith.constant 5.000000e-01 : f32
    %357 = vector.broadcast %cst_141 : f32 to vector<2x128xf32>
    %358 = arith.addf %356, %357 : vector<2x128xf32>
    %359 = math.tanh %343 : vector<2x128xf32>
    %360 = vector.extract_strided_slice %350 {offsets = [0, 32], sizes = [2, 32], strides = [1, 1]} : vector<2x128xf32> to vector<2x32xf32>
    %361 = arith.mulf %360, %321 : vector<2x32xf32>
    %362 = vector.extract_strided_slice %350 {offsets = [0, 0], sizes = [2, 32], strides = [1, 1]} : vector<2x128xf32> to vector<2x32xf32>
    %363 = vector.extract_strided_slice %351 {offsets = [0, 64], sizes = [2, 32], strides = [1, 1]} : vector<2x128xf32> to vector<2x32xf32>
    %364 = arith.mulf %362, %363 : vector<2x32xf32>
    %365 = arith.addf %361, %364 : vector<2x32xf32>
    %366 = vector.extract_strided_slice %358 {offsets = [0, 32], sizes = [2, 32], strides = [1, 1]} : vector<2x128xf32> to vector<2x32xf32>
    %367 = arith.mulf %366, %327 : vector<2x32xf32>
    %368 = vector.extract_strided_slice %358 {offsets = [0, 0], sizes = [2, 32], strides = [1, 1]} : vector<2x128xf32> to vector<2x32xf32>
    %369 = vector.extract_strided_slice %359 {offsets = [0, 64], sizes = [2, 32], strides = [1, 1]} : vector<2x128xf32> to vector<2x32xf32>
    %370 = arith.mulf %368, %369 : vector<2x32xf32>
    %371 = arith.addf %367, %370 : vector<2x32xf32>
    %372 = vector.extract_strided_slice %350 {offsets = [0, 96], sizes = [2, 32], strides = [1, 1]} : vector<2x128xf32> to vector<2x32xf32>
    %373 = math.tanh %365 : vector<2x32xf32>
    %374 = arith.mulf %372, %373 : vector<2x32xf32>
    %375 = vector.extract_strided_slice %358 {offsets = [0, 96], sizes = [2, 32], strides = [1, 1]} : vector<2x128xf32> to vector<2x32xf32>
    %376 = math.tanh %371 : vector<2x32xf32>
    %377 = arith.mulf %375, %376 : vector<2x32xf32>
    %c5_142 = arith.constant 5 : index
    %c0_143 = arith.constant 0 : index
    %c0_144 = arith.constant 0 : index
    %378 = vector.load %arg3[%c5_142, %c0_143, %c0_144] : memref<8x2x64xf32, #tpu.memory_space<vmem>>, vector<1x2x32xf32>
    %379 = vector.shape_cast %378 : vector<1x2x32xf32> to vector<2x32xf32>
    %380 = vector.shape_cast %374 : vector<2x32xf32> to vector<1x2x32xf32>
    tpu.vector_store %arg3[%c5_142, %c0_143, %c0_144], %380 {strides = array<i32>} : memref<8x2x64xf32, #tpu.memory_space<vmem>>, vector<1x2x32xf32>,
    %c2_145 = arith.constant 2 : index
    %c0_146 = arith.constant 0 : index
    %c32_147 = arith.constant 32 : index
    %381 = vector.load %arg3[%c2_145, %c0_146, %c32_147] : memref<8x2x64xf32, #tpu.memory_space<vmem>>, vector<1x2x32xf32>
    %382 = vector.shape_cast %381 : vector<1x2x32xf32> to vector<2x32xf32>
    %383 = vector.shape_cast %377 : vector<2x32xf32> to vector<1x2x32xf32>
    tpu.vector_store %arg3[%c2_145, %c0_146, %c32_147], %383 {strides = array<i32>} : memref<8x2x64xf32, #tpu.memory_space<vmem>>, vector<1x2x32xf32>,
    %cst_148 = arith.constant dense<0.000000e+00> : vector<2x128xf32>
    %384 = tpu.matmul %374, %1, %cst_148 {dimension_numbers = #tpu.dot_dimension_numbers<[1], [0], [0], [1], [0, 0, 1, 1], [], []>, precision = #tpu.contract_precision<fp32>} : vector<2x32xf32>, vector<32x128xf32>, vector<2x128xf32> -> vector<2x128xf32>
    %385 = arith.addf %98, %384 : vector<2x128xf32>
    %cst_149 = arith.constant dense<0.000000e+00> : vector<2x128xf32>
    %386 = tpu.matmul %377, %3, %cst_149 {dimension_numbers = #tpu.dot_dimension_numbers<[1], [0], [0], [1], [0, 0, 1, 1], [], []>, precision = #tpu.contract_precision<fp32>} : vector<2x32xf32>, vector<32x128xf32>, vector<2x128xf32> -> vector<2x128xf32>
    %387 = arith.addf %31, %386 : vector<2x128xf32>
    %cst_150 = arith.constant 5.000000e-01 : f32
    %388 = vector.broadcast %cst_150 : f32 to vector<2x128xf32>
    %389 = arith.mulf %388, %385 : vector<2x128xf32>
    %390 = math.tanh %389 : vector<2x128xf32>
    %cst_151 = arith.constant 5.000000e-01 : f32
    %391 = vector.broadcast %cst_151 : f32 to vector<2x128xf32>
    %392 = arith.mulf %391, %390 : vector<2x128xf32>
    %cst_152 = arith.constant 5.000000e-01 : f32
    %393 = vector.broadcast %cst_152 : f32 to vector<2x128xf32>
    %394 = arith.addf %392, %393 : vector<2x128xf32>
    %395 = math.tanh %385 : vector<2x128xf32>
    %cst_153 = arith.constant 5.000000e-01 : f32
    %396 = vector.broadcast %cst_153 : f32 to vector<2x128xf32>
    %397 = arith.mulf %396, %387 : vector<2x128xf32>
    %398 = math.tanh %397 : vector<2x128xf32>
    %cst_154 = arith.constant 5.000000e-01 : f32
    %399 = vector.broadcast %cst_154 : f32 to vector<2x128xf32>
    %400 = arith.mulf %399, %398 : vector<2x128xf32>
    %cst_155 = arith.constant 5.000000e-01 : f32
    %401 = vector.broadcast %cst_155 : f32 to vector<2x128xf32>
    %402 = arith.addf %400, %401 : vector<2x128xf32>
    %403 = math.tanh %387 : vector<2x128xf32>
    %404 = vector.extract_strided_slice %394 {offsets = [0, 32], sizes = [2, 32], strides = [1, 1]} : vector<2x128xf32> to vector<2x32xf32>
    %405 = arith.mulf %404, %365 : vector<2x32xf32>
    %406 = vector.extract_strided_slice %394 {offsets = [0, 0], sizes = [2, 32], strides = [1, 1]} : vector<2x128xf32> to vector<2x32xf32>
    %407 = vector.extract_strided_slice %395 {offsets = [0, 64], sizes = [2, 32], strides = [1, 1]} : vector<2x128xf32> to vector<2x32xf32>
    %408 = arith.mulf %406, %407 : vector<2x32xf32>
    %409 = arith.addf %405, %408 : vector<2x32xf32>
    %410 = vector.extract_strided_slice %402 {offsets = [0, 32], sizes = [2, 32], strides = [1, 1]} : vector<2x128xf32> to vector<2x32xf32>
    %411 = arith.mulf %410, %371 : vector<2x32xf32>
    %412 = vector.extract_strided_slice %402 {offsets = [0, 0], sizes = [2, 32], strides = [1, 1]} : vector<2x128xf32> to vector<2x32xf32>
    %413 = vector.extract_strided_slice %403 {offsets = [0, 64], sizes = [2, 32], strides = [1, 1]} : vector<2x128xf32> to vector<2x32xf32>
    %414 = arith.mulf %412, %413 : vector<2x32xf32>
    %415 = arith.addf %411, %414 : vector<2x32xf32>
    %416 = vector.extract_strided_slice %394 {offsets = [0, 96], sizes = [2, 32], strides = [1, 1]} : vector<2x128xf32> to vector<2x32xf32>
    %417 = math.tanh %409 : vector<2x32xf32>
    %418 = arith.mulf %416, %417 : vector<2x32xf32>
    %419 = vector.extract_strided_slice %402 {offsets = [0, 96], sizes = [2, 32], strides = [1, 1]} : vector<2x128xf32> to vector<2x32xf32>
    %420 = math.tanh %415 : vector<2x32xf32>
    %421 = arith.mulf %419, %420 : vector<2x32xf32>
    %c6_156 = arith.constant 6 : index
    %c0_157 = arith.constant 0 : index
    %c0_158 = arith.constant 0 : index
    %422 = vector.load %arg3[%c6_156, %c0_157, %c0_158] : memref<8x2x64xf32, #tpu.memory_space<vmem>>, vector<1x2x32xf32>
    %423 = vector.shape_cast %422 : vector<1x2x32xf32> to vector<2x32xf32>
    %424 = vector.shape_cast %418 : vector<2x32xf32> to vector<1x2x32xf32>
    tpu.vector_store %arg3[%c6_156, %c0_157, %c0_158], %424 {strides = array<i32>} : memref<8x2x64xf32, #tpu.memory_space<vmem>>, vector<1x2x32xf32>,
    %c1_159 = arith.constant 1 : index
    %c0_160 = arith.constant 0 : index
    %c32_161 = arith.constant 32 : index
    %425 = vector.load %arg3[%c1_159, %c0_160, %c32_161] : memref<8x2x64xf32, #tpu.memory_space<vmem>>, vector<1x2x32xf32>
    %426 = vector.shape_cast %425 : vector<1x2x32xf32> to vector<2x32xf32>
    %427 = vector.shape_cast %421 : vector<2x32xf32> to vector<1x2x32xf32>
    tpu.vector_store %arg3[%c1_159, %c0_160, %c32_161], %427 {strides = array<i32>} : memref<8x2x64xf32, #tpu.memory_space<vmem>>, vector<1x2x32xf32>,
    %cst_162 = arith.constant dense<0.000000e+00> : vector<2x128xf32>
    %428 = tpu.matmul %418, %1, %cst_162 {dimension_numbers = #tpu.dot_dimension_numbers<[1], [0], [0], [1], [0, 0, 1, 1], [], []>, precision = #tpu.contract_precision<fp32>} : vector<2x32xf32>, vector<32x128xf32>, vector<2x128xf32> -> vector<2x128xf32>
    %429 = arith.addf %112, %428 : vector<2x128xf32>
    %cst_163 = arith.constant dense<0.000000e+00> : vector<2x128xf32>
    %430 = tpu.matmul %421, %3, %cst_163 {dimension_numbers = #tpu.dot_dimension_numbers<[1], [0], [0], [1], [0, 0, 1, 1], [], []>, precision = #tpu.contract_precision<fp32>} : vector<2x32xf32>, vector<32x128xf32>, vector<2x128xf32> -> vector<2x128xf32>
    %431 = arith.addf %17, %430 : vector<2x128xf32>
    %cst_164 = arith.constant 5.000000e-01 : f32
    %432 = vector.broadcast %cst_164 : f32 to vector<2x128xf32>
    %433 = arith.mulf %432, %429 : vector<2x128xf32>
    %434 = math.tanh %433 : vector<2x128xf32>
    %cst_165 = arith.constant 5.000000e-01 : f32
    %435 = vector.broadcast %cst_165 : f32 to vector<2x128xf32>
    %436 = arith.mulf %435, %434 : vector<2x128xf32>
    %cst_166 = arith.constant 5.000000e-01 : f32
    %437 = vector.broadcast %cst_166 : f32 to vector<2x128xf32>
    %438 = arith.addf %436, %437 : vector<2x128xf32>
    %439 = math.tanh %429 : vector<2x128xf32>
    %cst_167 = arith.constant 5.000000e-01 : f32
    %440 = vector.broadcast %cst_167 : f32 to vector<2x128xf32>
    %441 = arith.mulf %440, %431 : vector<2x128xf32>
    %442 = math.tanh %441 : vector<2x128xf32>
    %cst_168 = arith.constant 5.000000e-01 : f32
    %443 = vector.broadcast %cst_168 : f32 to vector<2x128xf32>
    %444 = arith.mulf %443, %442 : vector<2x128xf32>
    %cst_169 = arith.constant 5.000000e-01 : f32
    %445 = vector.broadcast %cst_169 : f32 to vector<2x128xf32>
    %446 = arith.addf %444, %445 : vector<2x128xf32>
    %447 = math.tanh %431 : vector<2x128xf32>
    %448 = vector.extract_strided_slice %438 {offsets = [0, 32], sizes = [2, 32], strides = [1, 1]} : vector<2x128xf32> to vector<2x32xf32>
    %449 = arith.mulf %448, %409 : vector<2x32xf32>
    %450 = vector.extract_strided_slice %438 {offsets = [0, 0], sizes = [2, 32], strides = [1, 1]} : vector<2x128xf32> to vector<2x32xf32>
    %451 = vector.extract_strided_slice %439 {offsets = [0, 64], sizes = [2, 32], strides = [1, 1]} : vector<2x128xf32> to vector<2x32xf32>
    %452 = arith.mulf %450, %451 : vector<2x32xf32>
    %453 = arith.addf %449, %452 : vector<2x32xf32>
    %454 = vector.extract_strided_slice %446 {offsets = [0, 32], sizes = [2, 32], strides = [1, 1]} : vector<2x128xf32> to vector<2x32xf32>
    %455 = arith.mulf %454, %415 : vector<2x32xf32>
    %456 = vector.extract_strided_slice %446 {offsets = [0, 0], sizes = [2, 32], strides = [1, 1]} : vector<2x128xf32> to vector<2x32xf32>
    %457 = vector.extract_strided_slice %447 {offsets = [0, 64], sizes = [2, 32], strides = [1, 1]} : vector<2x128xf32> to vector<2x32xf32>
    %458 = arith.mulf %456, %457 : vector<2x32xf32>
    %459 = arith.addf %455, %458 : vector<2x32xf32>
    %460 = vector.extract_strided_slice %438 {offsets = [0, 96], sizes = [2, 32], strides = [1, 1]} : vector<2x128xf32> to vector<2x32xf32>
    %461 = math.tanh %453 : vector<2x32xf32>
    %462 = arith.mulf %460, %461 : vector<2x32xf32>
    %463 = vector.extract_strided_slice %446 {offsets = [0, 96], sizes = [2, 32], strides = [1, 1]} : vector<2x128xf32> to vector<2x32xf32>
    %464 = math.tanh %459 : vector<2x32xf32>
    %465 = arith.mulf %463, %464 : vector<2x32xf32>
    %c7_170 = arith.constant 7 : index
    %c0_171 = arith.constant 0 : index
    %c0_172 = arith.constant 0 : index
    %466 = vector.load %arg3[%c7_170, %c0_171, %c0_172] : memref<8x2x64xf32, #tpu.memory_space<vmem>>, vector<1x2x32xf32>
    %467 = vector.shape_cast %466 : vector<1x2x32xf32> to vector<2x32xf32>
    %468 = vector.shape_cast %462 : vector<2x32xf32> to vector<1x2x32xf32>
    tpu.vector_store %arg3[%c7_170, %c0_171, %c0_172], %468 {strides = array<i32>} : memref<8x2x64xf32, #tpu.memory_space<vmem>>, vector<1x2x32xf32>,
    %c0_173 = arith.constant 0 : index
    %c0_174 = arith.constant 0 : index
    %c32_175 = arith.constant 32 : index
    %469 = vector.load %arg3[%c0_173, %c0_174, %c32_175] : memref<8x2x64xf32, #tpu.memory_space<vmem>>, vector<1x2x32xf32>
    %470 = vector.shape_cast %469 : vector<1x2x32xf32> to vector<2x32xf32>
    %471 = vector.shape_cast %465 : vector<2x32xf32> to vector<1x2x32xf32>
    tpu.vector_store %arg3[%c0_173, %c0_174, %c32_175], %471 {strides = array<i32>} : memref<8x2x64xf32, #tpu.memory_space<vmem>>, vector<1x2x32xf32>,
    %c0_176 = arith.constant 0 : index
    %c0_177 = arith.constant 0 : index
    %c0_178 = arith.constant 0 : index
    %472 = vector.load %arg4[%c0_176, %c0_177, %c0_178] : memref<2x2x32xf32, #tpu.memory_space<vmem>>, vector<1x2x32xf32>
    %473 = vector.shape_cast %472 : vector<1x2x32xf32> to vector<2x32xf32>
    %474 = vector.shape_cast %453 : vector<2x32xf32> to vector<1x2x32xf32>
    tpu.vector_store %arg4[%c0_176, %c0_177, %c0_178], %474 {strides = array<i32>} : memref<2x2x32xf32, #tpu.memory_space<vmem>>, vector<1x2x32xf32>,
    %c1_179 = arith.constant 1 : index
    %c0_180 = arith.constant 0 : index
    %c0_181 = arith.constant 0 : index
    %475 = vector.load %arg4[%c1_179, %c0_180, %c0_181] : memref<2x2x32xf32, #tpu.memory_space<vmem>>, vector<1x2x32xf32>
    %476 = vector.shape_cast %475 : vector<1x2x32xf32> to vector<2x32xf32>
    %477 = vector.shape_cast %459 : vector<2x32xf32> to vector<1x2x32xf32>
    tpu.vector_store %arg4[%c1_179, %c0_180, %c0_181], %477 {strides = array<i32>} : memref<2x2x32xf32, #tpu.memory_space<vmem>>, vector<1x2x32xf32>,
    return
  }
}

</mosaic_0001>

<bundles_post_ra>
// kernel: my_lstm_forward.1
= control target key start
LH: loop header
LB: loop body
LE: loop exit
PB: predicated region body
PF: predicated region fallthrough
CT: control target
= control target key end

     0   :  { %10 = vsyncpa [#allocation5], 0  ;;  %s4844_s0 = inlined_call_operand.hbm [shape: s32[2,8], index: 0, kind: input, shape index: {}]   ;;  %s4845_s1 = inlined_call_operand.hbm [shape: f32[100,2,128], index: 1, kind: input, shape index: {}]   ;;  %s4846_s2 = inlined_call_operand.hbm [shape: f32[2,32,128], index: 2, kind: input, shape index: {}]   ;;  %s4847_s3 = inlined_call_operand.vmem [shape: f32[8,2,64], index: 3, kind: output, shape index: {0}]   ;;  %s4848_s4 = inlined_call_operand.hbm [shape: f32[2,2,32], index: 4, kind: output, shape index: {1}]  }
   0x1   :  { %11 = vsyncpa [#allocation3], 0 }
   0x2   :  { %12 = vsyncpa [#allocation8], 0 }
   0x3   :  { %13 = vsyncpa [#allocation4], 0  ;;  %s19_s17 = sshll.u32 %s4844_s0, 4  ;;  %s27_s20 = sshll.u32 %s4845_s1, 4  ;;  %s20_s17 = int_to_ptr.hbm [resolvable:$true] %s19_s17  ;;  %s28_s20 = int_to_ptr.hbm [resolvable:$true] %s27_s20 }
   0x4   :  { %s3983_s21 = smov [#allocation2]   ;;  %s3984_s22 = smov [#allocation6]  }
   0x5   :  { %22 = dma.hbm_to_smem %s20_s17, 32, %s3983_s21, [#allocation5]  }
   0x6   :  { %s29_s23 = sshll.u32 %s3984_s22, 4  ;;  %s3985_s24 = smov 32   ;;  %s30_s23 = int_to_ptr.vmem [resolvable:$true] %s29_s23 }
   0x7   :  { %s3986_s25 = smov 2   ;;  %s40_s0 = sshll.u32 %s4846_s2, 4  ;;  %s41_s0 = int_to_ptr.hbm [resolvable:$true] %s40_s0 }
   0x8   :  { %35 = dma.hbm_to_vmem [thread:$0]  %s28_s20, 3200, %s30_s23, [#allocation3], %s3985_s24, %s3985_s24, %s3986_s25  }
   0x9   :  { %s3987_s28 = smov [#allocation7]   ;;  %s3988_s1 = smov 128  }
   0xa   :  { %s42_s29 = sshll.u32 %s3987_s28, 4  ;;  %s3989_s30 = smov 8   ;;  %s43_s29 = int_to_ptr.vmem [resolvable:$true] %s42_s29 }
   0xb   :  { %48 = dma.hbm_to_vmem [thread:$0]  %s41_s0, 1024, %s43_s29, [#allocation8], %s3988_s1, %s3988_s1, %s3989_s30  }
   0xc   :  { %3975 = dma.done.wait [#allocation5], 32  }
   0xd   :  { %3976 = vsyncadd [#allocation5], 4294967264 }
   0xe   :  { %3977 = dma.done.wait [#allocation3], 3200  }
   0xf   :  { %3978 = vsyncadd [#allocation3], 4294964096 }
  0x10   :  { %3979 = dma.done.wait [#allocation8], 1024  }
  0x11   :  { %3980 = vsyncadd [#allocation8], 4294966272 }
  0x12   :  { %61 = sfence }
  0x13   :  { %v65_v0 = vld [vmem:[#allocation7 + $0x18] sm:$0xff]  ;;  %v64_v1 = vld [vmem:[#allocation7 + $0x10] sm:$0xff]  ;;  %v63_v2 = vld [vmem:[#allocation7 + $0x8] sm:$0xff]  ;;  %v3990_v40 = vmov 0.0   ;;  %s3732_s2 = sld [smem:[#allocation2 + $0x80]]  ;;  %vm82_vm0 = vcmask 1040384  }
  0x14   :  { %v4031_v3 = vand.u32 4294901760, %v65_v0  ;;  %v4033_v4 = vand.u32 4294901760, %v64_v1  ;;  %v4035_v5 = vand.u32 4294901760, %v63_v2  ;;  %v62_v6 = vld [vmem:[#allocation7] sm:$0xff]  ;;  %v70_v7 = vld [vmem:[#allocation7 + $0x38] sm:$0xff]  ;;  %v69_v8 = vld [vmem:[#allocation7 + $0x30] sm:$0xff] }
  0x15   :  { %v4037_v9 = vand.u32 4294901760, %v62_v6  ;;  %v4039_v10 = vand.u32 4294901760, %v70_v7  ;;  %v4041_v11 = vand.u32 4294901760, %v69_v8  ;;  %v68_v12 = vld [vmem:[#allocation7 + $0x28] sm:$0xff]  ;;  %v67_v13 = vld [vmem:[#allocation7 + $0x20] sm:$0xff]  ;;  %s71_s5 = sld [smem:[#allocation2]] }
  0x16   :  { %217 = vmatpush.msra.mxu0 %v4031_v3  ;;  %v4045_v14 = vsub.f32 %v65_v0, %v4031_v3  ;;  %317 = vmatpush.msra.mxu3 %v4031_v3  ;;  %v4049_v15 = vsub.f32 %v64_v1, %v4033_v4  ;;  %v4052_v16 = vsub.f32 %v63_v2, %v4035_v5  ;;  %v4054_v17 = vand.u32 4294901760, %v68_v12  ;;  %s3758_s8 = sld [smem:[#allocation2 + $0x7]]  ;;  %s3991_s16 = smov 64  }
  0x17   :  { %v4057_v18 = vsub.f32 %v62_v6, %v4037_v9  ;;  %v4060_v19 = vsub.f32 %v70_v7, %v4039_v10  ;;  %v4063_v20 = vsub.f32 %v69_v8, %v4041_v11  ;;  %v4065_v21 = vand.u32 4294901760, %v67_v13  ;;  %s3760_s10 = sld [smem:[#allocation2 + $0x87]] }
  0x18   :  { %288 = vmatpush.msra.mxu2 %v4045_v14  ;;  %219 = vmatpush.msra.mxu0 %v4033_v4  ;;  %v4070_v22 = vand.u32 4294901760, %v4045_v14  ;;  %v4073_v23 = vand.u32 4294901760, %v4049_v15  ;;  %v4076_v24 = vand.u32 4294901760, %v4052_v16  ;;  %v4079_v25 = vsub.f32 %v68_v12, %v4054_v17  ;;  %s3736_s19 = sld [smem:[#allocation2 + $0x81]] }
  0x19   :  { %319 = vmatpush.msra.mxu3 %v4033_v4  ;;  %v4083_v26 = vand.u32 4294901760, %v4060_v19  ;;  %v4086_v27 = vand.u32 4294901760, %v4057_v18  ;;  %v4089_v28 = vand.u32 4294901760, %v4063_v20  ;;  %v4092_v29 = vsub.f32 %v67_v13, %v4065_v21  ;;  %s3733_s6 = sshll.u32 %s3732_s2, 1  ;;  %s3734_s20 = sld [smem:[#allocation2 + $0x1]] }
  0x1a   :  { %291 = vmatpush.msra.mxu2 %v4049_v15  ;;  %221 = vmatpush.msra.mxu0 %v4035_v5  ;;  %v248_v30 = vsub.f32 %v4045_v14, %v4070_v22  ;;  %v254_v31 = vsub.f32 %v4049_v15, %v4073_v23  ;;  %v260_v32 = vsub.f32 %v4052_v16, %v4076_v24  ;;  %v4103_v33 = vand.u32 4294901760, %v4079_v25  ;;  %s4207_s9 = scalar_lea.vmem [#allocation6], %s3733_s6  ;;  %s3754_s27 = sld [smem:[#allocation2 + $0x6]] }
  0x1b   :  { %321 = vmatpush.msra.mxu3 %v4035_v5  ;;  %v434_v34 = vsub.f32 %v4060_v19, %v4083_v26  ;;  %v440_v35 = vsub.f32 %v4063_v20, %v4089_v28  ;;  %v266_v38 = vsub.f32 %v4057_v18, %v4086_v27  ;;  %v4119_v39 = vand.u32 4294901760, %v4092_v29  ;;  %s3731_s7 = sshll.u32 %s71_s5, 1  ;;  %v78_v54 = vld [vmem:[%s4207_s9] sm:$0x3]  ;;  %s3756_s0 = sld [smem:[#allocation2 + $0x86]] }
  0x1c   :  { %v4110_v36 = vand.u32 4294901760, %v248_v30  ;;  %294 = vmatpush.msra.mxu2 %v4052_v16  ;;  %223 = vmatpush.msra.mxu0 %v4037_v9  ;;  %v4114_v37 = vand.u32 4294901760, %v254_v31  ;;  %v4126_v42 = vand.u32 4294901760, %v260_v32  ;;  %v446_v43 = vsub.f32 %v4079_v25, %v4103_v33  ;;  %s4210_s11 = scalar_lea.vmem [#allocation6], %s3731_s7  ;;  %s3759_s12 = sshll.u32 %s3758_s8, 1 }
  0x1d   :  { %323 = vmatpush.msra.mxu3 %v4037_v9  ;;  %229 = vmatmul.f32.vlgmr.msra.gmra.mxu0 %v3990_v40  ;;  %v4122_v41 = vand.u32 4294901760, %v434_v34  ;;  %v4130_v44 = vand.u32 4294901760, %v440_v35  ;;  %v4134_v45 = vand.u32 4294901760, %v266_v38  ;;  %v452_v46 = vsub.f32 %v4092_v29, %v4119_v39  ;;  %v74_v59 = vld [vmem:[%s4210_s11] sm:$0x3]  ;;  %s3761_s13 = sshll.u32 %s3760_s10, 1 }
  0x1e   :  { %250 = vmatpush.msra.mxu1 %v4110_v36  ;;  %297 = vmatpush.msra.mxu2 %v4057_v18  ;;  %v4142_v47 = vand.u32 4294901760, %v446_v43  ;;  %v80_v58 = vrot.slane %v78_v54, 7  ;;  %s4214_s14 = scalar_lea.vmem [#allocation6], %s3759_s12  ;;  %s4217_s15 = scalar_lea.vmem [#allocation6], %s3761_s13  ;;  %vm200_vm1 = vcmask 261120   ;;  %vm624_vm2 = vcmask 254976  }
  0x1f   :  { %300 = vmatmul.f32.vlgmr.msra.gmra.mxu2 %v3990_v40  ;;  %327 = vmatmul.f32.vlgmr.msra.gmra.mxu3 %v3990_v40  ;;  %v4148_v48 = vand.u32 4294901760, %v452_v46  ;;  %v187_v8 = vld [vmem:[%s4214_s14] sm:$0x3]  ;;  %s3737_s21 = sshll.u32 %s3736_s19, 1  ;;  %s3735_s22 = sshll.u32 %s3734_s20, 1  ;;  %vm631_vm3 = vcmask 517376  }
  0x20   :  { %256 = vmatpush.msra.mxu1 %v4114_v37  ;;  %403 = vmatpush.msrb.mxu2 %v4039_v10  ;;  %v83_v61 = vsel %vm82_vm0, %v74_v59, %v80_v58  ;;  %v197_v31 = vrot.slane %v187_v8, 1  ;;  %v191_v34 = vld [vmem:[%s4217_s15] sm:$0x3]  ;;  %s4292_s23 = scalar_lea.vmem [#allocation6], %s3737_s21  ;;  %s4295_s26 = scalar_lea.vmem [#allocation6], %s3735_s22 }
  0x21   :  { %346 = vmatpush.msrb.mxu0 %v4070_v22  ;;  %436 = vmatpush.msrb.mxu3 %v4122_v41  ;;  %s3755_s28 = sshll.u32 %s3754_s27, 1  ;;  %s3757_s29 = sshll.u32 %s3756_s0, 1 }
  0x22   :  { %262 = vmatpush.msra.mxu1 %v4126_v42  ;;  %405 = vmatpush.msrb.mxu2 %v4041_v11  ;;  %s4300_s1 = scalar_lea.vmem [#allocation6], %s3755_s28  ;;  %s4303_s30 = scalar_lea.vmem [#allocation6], %s3757_s29 }
  0x23   :  { %350 = vmatpush.msrb.mxu0 %v4073_v23  ;;  %442 = vmatpush.msrb.mxu3 %v4130_v44  ;;  %s3740_s6 = sld [smem:[#allocation2 + $0x82]] }
  0x24   :  { %268 = vmatpush.msra.mxu1 %v4134_v45  ;;  %407 = vmatpush.msrb.mxu2 %v4054_v17  ;;  %s3738_s7 = sld [smem:[#allocation2 + $0x2]] }
  0x25   :  { %270 = vmatmul.f32.vlgmr.msra.gmra.mxu1 %v3990_v40  ;;  %354 = vmatpush.msrb.mxu0 %v4076_v24  ;;  %s3750_s17 = sld [smem:[#allocation2 + $0x5]] }
  0x26   :  { %377 = vmatpush.msrb.mxu1 %v4031_v3  ;;  %448 = vmatpush.msrb.mxu3 %v4142_v47  ;;  %s3752_s18 = sld [smem:[#allocation2 + $0x85]] }
  0x27   :  { %409 = vmatpush.msrb.mxu2 %v4065_v21  ;;  %358 = vmatpush.msrb.mxu0 %v4086_v27  ;;  %s3744_s28 = sld [smem:[#allocation2 + $0x83]] }
  0x28   :  { %379 = vmatpush.msrb.mxu1 %v4033_v4  ;;  %454 = vmatpush.msrb.mxu3 %v4148_v48  ;;  %s3742_s29 = sld [smem:[#allocation2 + $0x3]] }
  0x29   :  { %360 = vmatmul.f32.vlgmr.msrb.gmra.mxu0 %v3990_v40  ;;  %415 = vmatmul.f32.vlgmr.msrb.gmra.mxu2 %v3990_v40  ;;  %s3741_s8 = sshll.u32 %s3740_s6, 1 }
  0x2a   :  { %381 = vmatpush.msrb.mxu1 %v4035_v5  ;;  %456 = vmatmul.f32.vlgmr.msrb.gmra.mxu3 %v3990_v40  ;;  %s3739_s10 = sshll.u32 %s3738_s7, 1  ;;  %s110_s12 = scalar_lea.vmem [#allocation6], %s3741_s8 }
  0x2b   :  { %532 = vmatpush.msra.mxu2 %v4083_v26  ;;  %474 = vmatpush.msra.mxu0 %v4060_v19  ;;  %s106_s13 = scalar_lea.vmem [#allocation6], %s3739_s10  ;;  %s3751_s19 = sshll.u32 %s3750_s17, 1 }
  0x2c   :  { %383 = vmatpush.msrb.mxu1 %v4037_v9  ;;  %563 = vmatpush.msra.mxu3 %v4039_v10  ;;  %s3753_s20 = sshll.u32 %s3752_s18, 1  ;;  %s154_s21 = scalar_lea.vmem [#allocation6], %s3751_s19 }
  0x2d   :  { %536 = vmatpush.msra.mxu2 %v4089_v28  ;;  %477 = vmatpush.msra.mxu0 %v4063_v20  ;;  %s158_s22 = scalar_lea.vmem [#allocation6], %s3753_s20  ;;  %s3745_s2 = sshll.u32 %s3744_s28, 1 }
  0x2e   :  { %385 = vmatmul.f32.vlgmr.msrb.gmra.mxu1 %v3990_v40  ;;  %565 = vmatpush.msra.mxu3 %v4041_v11  ;;  %s3743_s5 = sshll.u32 %s3742_s29, 1  ;;  %s126_s6 = scalar_lea.vmem [#allocation6], %s3745_s2 }
  0x2f   :  { %503 = vmatpush.msra.mxu1 %v4039_v10  ;;  %540 = vmatpush.msra.mxu2 %v4103_v33  ;;  %s122_s7 = scalar_lea.vmem [#allocation6], %s3743_s5  ;;  %s3746_s8 = sld [smem:[#allocation2 + $0x4]] }
  0x30   :  { %480 = vmatpush.msra.mxu0 %v4079_v25  ;;  %567 = vmatpush.msra.mxu3 %v4054_v17  ;;  %s3748_s10 = sld [smem:[#allocation2 + $0x84]] }
  0x31   :  { %505 = vmatpush.msra.mxu1 %v4041_v11  ;;  %544 = vmatpush.msra.mxu2 %v4119_v39 }
  0x32   :  { %483 = vmatpush.msra.mxu0 %v4092_v29  ;;  %546 = vmatmul.f32.vlgmr.msra.gmra.mxu2 %v3990_v40 }
  0x33   :  { %486 = vmatmul.f32.vlgmr.msra.gmra.mxu0 %v3990_v40  ;;  %507 = vmatpush.msra.mxu1 %v4054_v17 }
  0x34   :  { %569 = vmatpush.msra.mxu3 %v4065_v21  ;;  %719 = vmatpush.msrb.mxu2 %v4045_v14 }
  0x35   :  { %509 = vmatpush.msra.mxu1 %v4065_v21  ;;  %571 = vmatmul.f32.vlgmr.msra.gmra.mxu3 %v3990_v40 }
  0x36   :  { %513 = vmatmul.f32.vlgmr.msra.gmra.mxu1 %v3990_v40  ;;  %722 = vmatpush.msrb.mxu2 %v4049_v15  ;;  %v199_v40 = vsel %vm82_vm0, %v197_v31, %v191_v34 }
  0x37   :  { %681 = vmatpush.msrb.mxu1 %v4110_v36  ;;  %748 = vmatpush.msrb.mxu3 %v4031_v3 }
  0x38   :  { %725 = vmatpush.msrb.mxu2 %v4052_v16  ;;  %648 = vmatpush.msrb.mxu0 %v4031_v3 }
  0x39   :  { %687 = vmatpush.msrb.mxu1 %v4114_v37  ;;  %750 = vmatpush.msrb.mxu3 %v4033_v4 }
  0x3a   :  { %728 = vmatpush.msrb.mxu2 %v4057_v18  ;;  %650 = vmatpush.msrb.mxu0 %v4033_v4 }
  0x3b   :  { %693 = vmatpush.msrb.mxu1 %v4126_v42  ;;  %752 = vmatpush.msrb.mxu3 %v4035_v5 }
  0x3c   :  { %652 = vmatpush.msrb.mxu0 %v4035_v5  ;;  %838 = vmatpush.msra.mxu2 %v4039_v10 }
  0x3d   :  { %699 = vmatpush.msrb.mxu1 %v4134_v45  ;;  %754 = vmatpush.msrb.mxu3 %v4037_v9 }
  0x3e   :  { %654 = vmatpush.msrb.mxu0 %v4037_v9  ;;  %840 = vmatpush.msra.mxu2 %v4041_v11 }
  0x3f   :  { %808 = vmatpush.msra.mxu1 %v4031_v3  ;;  %871 = vmatpush.msra.mxu3 %v4122_v41 }
  0x40   :  { %777 = vmatpush.msra.mxu0 %v4070_v22  ;;  %842 = vmatpush.msra.mxu2 %v4054_v17 }
  0x41   :  { %810 = vmatpush.msra.mxu1 %v4033_v4  ;;  %877 = vmatpush.msra.mxu3 %v4130_v44 }
  0x42   :  { %781 = vmatpush.msra.mxu0 %v4073_v23  ;;  %844 = vmatpush.msra.mxu2 %v4065_v21 }
  0x43   :  { %812 = vmatpush.msra.mxu1 %v4035_v5  ;;  %883 = vmatpush.msra.mxu3 %v4142_v47 }
  0x44   :  { %785 = vmatpush.msra.mxu0 %v4076_v24 }
  0x45   :  { %814 = vmatpush.msra.mxu1 %v4037_v9  ;;  %889 = vmatpush.msra.mxu3 %v4148_v48 }
  0x46   :  { %789 = vmatpush.msra.mxu0 %v4086_v27 }
  0x9a   :  { %v230_v49 = vpop.f32.mrf.mxu0 }
  0xa2   :  { %v271_v50 = vpop.f32.mrf.mxu1  ;;  %v301_v51 = vpop.f32.mrf.mxu2 }
  0xa3   :  { %v272_v52 = vadd.f32 %v271_v50, %v230_v49  ;;  %v328_v53 = vpop.f32.mrf.mxu3 }
  0xa5   :  { %v302_v55 = vadd.f32 %v301_v51, %v272_v52 }
  0xa6   :  { %v361_v56 = vpop.f32.mrf.mxu0 }
  0xa7   :  { %v329_v57 = vadd.f32 %v328_v53, %v302_v55 }
  0xa9   :  { %v362_v60 = vadd.f32 %v361_v56, %v329_v57 }
  0xab   :  { %v386_v62 = vpop.f32.mrf.mxu1 }
  0xac   :  { %v387_v63 = vadd.f32 %v386_v62, %v362_v60  ;;  %v416_v0 = vpop.f32.mrf.mxu2 }
  0xad   :  { %v457_v1 = vpop.f32.mrf.mxu3 }
  0xae   :  { %v389_v2 = vadd.f32 %v387_v63, %v83_v61  ;;  %v458_v6 = vadd.f32 %v457_v1, %v416_v0 }
  0xb0   :  { %3787 = vtanh.f32 %v389_v2  ;;  %v487_v7 = vpop.f32.mrf.mxu0  ;;  %v576_v51 = vmul.f32 0.5, %v389_v2 }
  0xb1   :  { %v488_v12 = vadd.f32 %v487_v7, %v458_v6 }
  0xb3   :  { %v514_v13 = vpop.f32.mrf.mxu1 }
  0xb4   :  { %v515_v30 = vadd.f32 %v514_v13, %v488_v12 }
  0xb5   :  { %v547_v32 = vpop.f32.mrf.mxu2 }
  0xb6   :  { %v3788_v35 = vpop.eup %3787  ;;  %v548_v38 = vadd.f32 %v547_v32, %v515_v30 }
  0xb7   :  { %588 = vrot.lane.b32.xlu0 %v3788_v35, %s3991_s16 }
  0xb8   :  { %v572_v43 = vpop.f32.mrf.mxu3 }
  0xb9   :  { %v573_v46 = vadd.f32 %v572_v43, %v548_v38 }
  0xbb   :  { %v575_v49 = vadd.f32 %v573_v46, %v199_v40 }
  0xbd   :  { %3789 = vtanh.f32 %v575_v49  ;;  %v581_v53 = vmul.f32 0.5, %v575_v49 }
  0xbe   :  { %3791 = vtanh.f32 %v576_v51 }
  0xbf   :  { %3793 = vtanh.f32 %v581_v53 }
  0xc3   :  { %v3790_v50 = vpop.eup %3789 }
  0xc4   :  { %599 = vrot.lane.b32.xlu0 %v3790_v50, %s3991_s16  ;;  %v3792_v52 = vpop.eup %3791 }
  0xc5   :  { %v578_v54 = vmul.f32 0.5, %v3792_v52  ;;  %v3794_v58 = vpop.eup %3793 }
  0xc6   :  { %v583_v59 = vmul.f32 0.5, %v3794_v58 }
  0xc7   :  { %v579_v55 = vadd.f32 0.5, %v578_v54 }
  0xc8   :  { %v584_v60 = vadd.f32 0.5, %v583_v59 }
  0xc9   :  { %v586_v63 = vmul.f32 0.0, %v579_v55 }
  0xca   :  { %v597_v6 = vmul.f32 0.0, %v584_v60 }
 0x129   :  { %v589_v56 = vpop.permute.xlu0 %588 }
 0x12a   :  { %v591_v57 = vmul.f32 %v589_v56, %v579_v55 }
 0x12c   :  { %593 = vrot.lane.b32.xlu1 %v591_v57, %s3985_s24 }
 0x136   :  { %v600_v61 = vpop.permute.xlu0 %599 }
 0x137   :  { %v602_v62 = vmul.f32 %v600_v61, %v584_v60 }
 0x139   :  { %604 = vrot.lane.b32.xlu1 %v602_v62, %s3985_s24  ;;  %v95_v62 = vld [vmem:[%s4292_s23] sm:$0x3] }
 0x19e   :  { %v594_v0 = vpop.permute.xlu1 %593 }
 0x19f   :  { %v4225_v1 = vadd.f32 %v594_v0, %v586_v63  ;;  %v97_v0 = vrot.slane %v95_v62, 7 }
 0x1a1   :  { %3795 = vtanh.f32 %v4225_v1 }
 0x1a7   :  { %v3796_v2 = vpop.eup %3795 }
 0x1a8   :  { %610 = vrot.lane.b32.xlu2 %v3796_v2, %s3991_s16 }
 0x1ab   :  { %v605_v7 = vpop.permute.xlu1 %604 }
 0x1ac   :  { %v4229_v8 = vadd.f32 %v605_v7, %v597_v6  ;;  %v91_v6 = vld [vmem:[%s4295_s26] sm:$0x3] }
 0x1ae   :  { %3797 = vtanh.f32 %v4229_v8 }
 0x1b4   :  { %v3798_v12 = vpop.eup %3797 }
 0x1b5   :  { %616 = vrot.lane.b32.xlu2 %v3798_v12, %s3991_s16 }
 0x202   :  { %v611_v13 = vpop.permute.xlu2 %610 }
 0x203   :  { %v613_v30 = vmul.f32 %v611_v13, %v579_v55 }
 0x205   :  { %621 = vrot.lane.b32.xlu0 %v613_v30, %s3985_s24  ;;  %v99_v30 = vsel %vm82_vm0, %v91_v6, %v97_v0 }
 0x20f   :  { %v617_v31 = vpop.permute.xlu2 %616 }
 0x210   :  { %v4234_v32 = vmul.f32 %v617_v31, %v584_v60 }
 0x212   :  { %821 = vrot.lane.b32.xlu1 %v4234_v32, %s3985_s24 }
 0x277   :  { %v622_v34 = vpop.permute.xlu0 %621 }
 0x278   :  { %625 = vst.msk [vmem:[%s4847_s3] sm:$0x3] %vm624_vm2, %v622_v34  ;;  %v633_v35 = vsel %vm200_vm1, %v622_v34, 0 }
 0x279   :  { %v655_v38 = vand.u32 4294901760, %v633_v35 }
 0x27b   :  { %v656_v40 = vsub.f32 %v633_v35, %v655_v38  ;;  %701 = vmatmul.f32.vlgmr.msrb.gmra.mxu1 %v655_v38 }
 0x27c   :  { %938 = vmatpush.msrb.mxu1 %v4039_v10 }
 0x27d   :  { %v657_v43 = vand.u32 4294901760, %v656_v40  ;;  %731 = vmatmul.f32.vlgmr.msrb.gmra.mxu2 %v656_v40 }
 0x27e   :  { %940 = vmatpush.msrb.mxu1 %v4041_v11  ;;  %967 = vmatpush.msrb.mxu2 %v4083_v26 }
 0x27f   :  { %v658_v46 = vsub.f32 %v656_v40, %v657_v43  ;;  %758 = vmatmul.f32.vlgmr.msrb.gmra.mxu3 %v657_v43 }
 0x280   :  { %942 = vmatpush.msrb.mxu1 %v4054_v17  ;;  %998 = vmatpush.msrb.mxu3 %v4039_v10 }
 0x281   :  { %v659_v49 = vand.u32 4294901760, %v658_v46  ;;  %971 = vmatpush.msrb.mxu2 %v4089_v28 }
 0x282   :  { %944 = vmatpush.msrb.mxu1 %v4065_v21  ;;  %1000 = vmatpush.msrb.mxu3 %v4041_v11 }
 0x283   :  { %660 = vmatmul.f32.vlgmr.msrb.gmra.mxu0 %v659_v49  ;;  %816 = vmatmul.f32.vlgmr.msra.gmra.mxu1 %v655_v38 }
 0x284   :  { %v822_v50 = vpop.permute.xlu1 %821  ;;  %909 = vmatpush.msrb.mxu0 %v4060_v19  ;;  %1002 = vmatpush.msrb.mxu3 %v4054_v17 }
 0x285   :  { %v823_v51 = vsel %vm200_vm1, %v822_v50, 0  ;;  %975 = vmatpush.msrb.mxu2 %v4103_v33  ;;  %1115 = vmatpush.msra.mxu1 %v4110_v36  ;;  %v171_v50 = vld [vmem:[%s4300_s1] sm:$0x3] }
 0x286   :  { %v845_v52 = vand.u32 4294901760, %v823_v51  ;;  %912 = vmatpush.msrb.mxu0 %v4063_v20  ;;  %1004 = vmatpush.msrb.mxu3 %v4065_v21 }
 0x287   :  { %979 = vmatpush.msrb.mxu2 %v4119_v39  ;;  %1121 = vmatpush.msra.mxu1 %v4114_v37 }
 0x288   :  { %v846_v53 = vsub.f32 %v823_v51, %v845_v52  ;;  %891 = vmatmul.f32.vlgmr.msra.gmra.mxu3 %v845_v52  ;;  %915 = vmatpush.msrb.mxu0 %v4079_v25 }
 0x289   :  { %1127 = vmatpush.msra.mxu1 %v4126_v42  ;;  %1182 = vmatpush.msra.mxu3 %v4031_v3 }
 0x28a   :  { %v847_v54 = vand.u32 4294901760, %v846_v53  ;;  %918 = vmatpush.msrb.mxu0 %v4092_v29 }
 0x28b   :  { %791 = vmatmul.f32.vlgmr.msra.gmra.mxu0 %v655_v38  ;;  %1133 = vmatpush.msra.mxu1 %v4134_v45 }
 0x28c   :  { %v848_v55 = vsub.f32 %v846_v53, %v847_v54  ;;  %948 = vmatmul.f32.vlgmr.msrb.gmra.mxu1 %v847_v54  ;;  %1184 = vmatpush.msra.mxu3 %v4033_v4 }
 0x28d   :  { %1082 = vmatpush.msra.mxu0 %v4031_v3  ;;  %1242 = vmatpush.msrb.mxu1 %v4031_v3 }
 0x28e   :  { %v849_v56 = vand.u32 4294901760, %v848_v55  ;;  %1186 = vmatpush.msra.mxu3 %v4035_v5 }
 0x28f   :  { %1084 = vmatpush.msra.mxu0 %v4033_v4  ;;  %1244 = vmatpush.msrb.mxu1 %v4033_v4 }
 0x290   :  { %850 = vmatmul.f32.vlgmr.msra.gmra.mxu2 %v849_v56  ;;  %1006 = vmatmul.f32.vlgmr.msrb.gmra.mxu3 %v845_v52 }
 0x291   :  { %1153 = vmatpush.msra.mxu2 %v4045_v14  ;;  %1188 = vmatpush.msra.mxu3 %v4037_v9 }
 0x292   :  { %1086 = vmatpush.msra.mxu0 %v4035_v5  ;;  %1246 = vmatpush.msrb.mxu1 %v4035_v5 }
 0x293   :  { %921 = vmatmul.f32.vlgmr.msrb.gmra.mxu0 %v846_v53  ;;  %1156 = vmatpush.msra.mxu2 %v4049_v15  ;;  %v175_v53 = vld [vmem:[%s4303_s30] sm:$0x3] }
 0x294   :  { %1088 = vmatpush.msra.mxu0 %v4037_v9  ;;  %1248 = vmatpush.msrb.mxu1 %v4037_v9 }
 0x295   :  { %1159 = vmatpush.msra.mxu2 %v4052_v16  ;;  %1305 = vmatpush.msrb.mxu3 %v4122_v41 }
 0x296   :  { %1211 = vmatpush.msrb.mxu0 %v4070_v22 }
 0x297   :  { %1162 = vmatpush.msra.mxu2 %v4057_v18  ;;  %1311 = vmatpush.msrb.mxu3 %v4130_v44 }
 0x298   :  { %1215 = vmatpush.msrb.mxu0 %v4073_v23  ;;  %981 = vmatmul.f32.vlgmr.msrb.gmra.mxu2 %v845_v52  ;;  %v181_v52 = vrot.slane %v171_v50, 1 }
 0x299   :  { %1272 = vmatpush.msrb.mxu2 %v4039_v10  ;;  %1317 = vmatpush.msrb.mxu3 %v4142_v47 }
 0x29a   :  { %1219 = vmatpush.msrb.mxu0 %v4076_v24 }
 0x29b   :  { %1274 = vmatpush.msrb.mxu2 %v4041_v11  ;;  %1323 = vmatpush.msrb.mxu3 %v4148_v48 }
 0x29c   :  { %1223 = vmatpush.msrb.mxu0 %v4086_v27 }
 0x29d   :  { %1276 = vmatpush.msrb.mxu2 %v4054_v17 }
 0x29f   :  { %1278 = vmatpush.msrb.mxu2 %v4065_v21 }
 0x2f8   :  { %v702_v57 = vpop.f32.mrf.mxu1 }
 0x300   :  { %v661_v58 = vpop.f32.mrf.mxu0  ;;  %v732_v60 = vpop.f32.mrf.mxu2 }
 0x301   :  { %v703_v59 = vadd.f32 %v702_v57, %v661_v58  ;;  %v817_v13 = vpop.f32.mrf.mxu1  ;;  %v183_v58 = vsel %vm82_vm0, %v181_v52, %v175_v53 }
 0x302   :  { %v759_v63 = vpop.f32.mrf.mxu3 }
 0x303   :  { %v733_v61 = vadd.f32 %v732_v60, %v703_v59 }
 0x305   :  { %v760_v2 = vadd.f32 %v759_v63, %v733_v61 }
 0x308   :  { %v792_v7 = vpop.f32.mrf.mxu0 }
 0x309   :  { %v793_v12 = vadd.f32 %v792_v7, %v760_v2  ;;  %v949_v51 = vpop.f32.mrf.mxu1 }
 0x30b   :  { %v818_v31 = vadd.f32 %v817_v13, %v793_v12  ;;  %v892_v35 = vpop.f32.mrf.mxu3 }
 0x30d   :  { %v820_v34 = vadd.f32 %v818_v31, %v99_v30 }
 0x30f   :  { %3799 = vtanh.f32 %v820_v34  ;;  %v1011_v62 = vmul.f32 0.5, %v820_v34 }
 0x310   :  { %v922_v46 = vpop.f32.mrf.mxu0 }
 0x313   :  { %v851_v38 = vpop.f32.mrf.mxu2  ;;  %v1007_v57 = vpop.f32.mrf.mxu3 }
 0x314   :  { %v893_v40 = vadd.f32 %v892_v35, %v851_v38 }
 0x315   :  { %v3800_v43 = vpop.eup %3799 }
 0x316   :  { %v923_v49 = vadd.f32 %v922_v46, %v893_v40  ;;  %1023 = vrot.lane.b32.xlu2 %v3800_v43, %s3991_s16 }
 0x318   :  { %v950_v54 = vadd.f32 %v949_v51, %v923_v49 }
 0x31b   :  { %v982_v55 = vpop.f32.mrf.mxu2 }
 0x31c   :  { %v983_v56 = vadd.f32 %v982_v55, %v950_v54 }
 0x31e   :  { %v1008_v59 = vadd.f32 %v1007_v57, %v983_v56 }
 0x320   :  { %v1010_v60 = vadd.f32 %v1008_v59, %v183_v58 }
 0x322   :  { %3801 = vtanh.f32 %v1010_v60  ;;  %v1016_v12 = vmul.f32 0.5, %v1010_v60 }
 0x323   :  { %3803 = vtanh.f32 %v1011_v62 }
 0x324   :  { %3805 = vtanh.f32 %v1016_v12 }
 0x328   :  { %v3802_v61 = vpop.eup %3801 }
 0x329   :  { %1034 = vrot.lane.b32.xlu0 %v3802_v61, %s3991_s16  ;;  %v3804_v63 = vpop.eup %3803 }
 0x32a   :  { %v1013_v0 = vmul.f32 0.5, %v3804_v63  ;;  %v3806_v13 = vpop.eup %3805 }
 0x32b   :  { %v1018_v30 = vmul.f32 0.5, %v3806_v13 }
 0x32c   :  { %v1014_v2 = vadd.f32 0.5, %v1013_v0 }
 0x32d   :  { %v1019_v31 = vadd.f32 0.5, %v1018_v30 }
 0x32e   :  { %v1021_v40 = vmul.f32 %v1014_v2, %v4225_v1 }
 0x32f   :  { %v1032_v49 = vmul.f32 %v1019_v31, %v4229_v8 }
 0x370   :  { %v1024_v6 = vpop.permute.xlu2 %1023 }
 0x371   :  { %v1026_v7 = vmul.f32 %v1024_v6, %v1014_v2 }
 0x373   :  { %1028 = vrot.lane.b32.xlu1 %v1026_v7, %s3985_s24 }
 0x39b   :  { %v1035_v35 = vpop.permute.xlu0 %1034 }
 0x39c   :  { %v1037_v38 = vmul.f32 %v1035_v35, %v1019_v31 }
 0x39e   :  { %1039 = vrot.lane.b32.xlu2 %v1037_v38, %s3985_s24 }
 0x3e5   :  { %v1029_v34 = vpop.permute.xlu1 %1028 }
 0x3e6   :  { %v4311_v43 = vadd.f32 %v1029_v34, %v1021_v40  ;;  %v4379_v40 = vld [vmem:[%s110_s12] sm:$0x3]  ;;  %s3747_s12 = sshll.u32 %s3746_s8, 1 }
 0x3e7   :  { %s138_s17 = scalar_lea.vmem [#allocation6], %s3747_s12 }
 0x3e8   :  { %3807 = vtanh.f32 %v4311_v43 }
 0x3ee   :  { %v3808_v46 = vpop.eup %3807 }
 0x3ef   :  { %1045 = vrot.lane.b32.xlu0 %v3808_v46, %s3991_s16  ;;  %v113_v46 = vrot.slane %v4379_v40, 7 }
 0x3f8   :  { %v1040_v50 = vpop.permute.xlu2 %1039 }
 0x3f9   :  { %v4316_v51 = vadd.f32 %v1040_v50, %v1032_v49  ;;  %v4382_v50 = vld [vmem:[%s106_s13] sm:$0x3]  ;;  %s3749_s13 = sshll.u32 %s3748_s10, 1  ;;  %s3993_s10 = smov [#allocation9]  }
 0x3fa   :  { %s142_s18 = scalar_lea.vmem [#allocation6], %s3749_s13  ;;  %s3680_s12 = sshll.u32 %s3993_s10, 4  ;;  %s3681_s12 = int_to_ptr.vmem [resolvable:$true] %s3680_s12 }
 0x3fb   :  { %3809 = vtanh.f32 %v4316_v51 }
 0x401   :  { %v3810_v52 = vpop.eup %3809 }
 0x402   :  { %1051 = vrot.lane.b32.xlu1 %v3810_v52, %s3991_s16 }
 0x461   :  { %v1046_v53 = vpop.permute.xlu0 %1045 }
 0x462   :  { %v1048_v1 = vmul.f32 %v1046_v53, %v1014_v2 }
 0x464   :  { %1056 = vrot.lane.b32.xlu2 %v1048_v1, %s3985_s24 }
 0x474   :  { %v1052_v54 = vpop.permute.xlu1 %1051 }
 0x475   :  { %v4321_v55 = vmul.f32 %v1052_v54, %v1019_v31  ;;  %v115_v54 = vsel %vm82_vm0, %v4382_v50, %v113_v46 }
 0x477   :  { %1255 = vrot.lane.b32.xlu0 %v4321_v55, %s3985_s24 }
 0x4be   :  { %v1057_v56 = vpop.permute.xlu2 %1056 }
 0x4bf   :  { %3763 = vst.msk [vmem:[%s4847_s3 + $0x2] sm:$0x3] %vm624_vm2, %v1057_v56  ;;  %v1067_v8 = vsel %vm200_vm1, %v1057_v56, 0 }
 0x4c0   :  { %v1089_v57 = vand.u32 4294901760, %v1067_v8 }
 0x4c2   :  { %v1090_v58 = vsub.f32 %v1067_v8, %v1089_v57  ;;  %1135 = vmatmul.f32.vlgmr.msra.gmra.mxu1 %v1089_v57 }
 0x4c3   :  { %1372 = vmatpush.msra.mxu1 %v4039_v10 }
 0x4c4   :  { %v1091_v59 = vand.u32 4294901760, %v1090_v58  ;;  %1165 = vmatmul.f32.vlgmr.msra.gmra.mxu2 %v1090_v58 }
 0x4c5   :  { %1374 = vmatpush.msra.mxu1 %v4041_v11  ;;  %1401 = vmatpush.msra.mxu2 %v4083_v26 }
 0x4c6   :  { %v1092_v60 = vsub.f32 %v1090_v58, %v1091_v59  ;;  %1192 = vmatmul.f32.vlgmr.msra.gmra.mxu3 %v1091_v59 }
 0x4c7   :  { %1376 = vmatpush.msra.mxu1 %v4054_v17  ;;  %1432 = vmatpush.msra.mxu3 %v4039_v10 }
 0x4c8   :  { %v1093_v61 = vand.u32 4294901760, %v1092_v60  ;;  %1405 = vmatpush.msra.mxu2 %v4089_v28 }
 0x4c9   :  { %1378 = vmatpush.msra.mxu1 %v4065_v21  ;;  %1434 = vmatpush.msra.mxu3 %v4041_v11 }
 0x4ca   :  { %1094 = vmatmul.f32.vlgmr.msra.gmra.mxu0 %v1093_v61  ;;  %1250 = vmatmul.f32.vlgmr.msrb.gmra.mxu1 %v1089_v57 }
 0x4cb   :  { %1343 = vmatpush.msra.mxu0 %v4060_v19  ;;  %1436 = vmatpush.msra.mxu3 %v4054_v17 }
 0x4cc   :  { %1409 = vmatpush.msra.mxu2 %v4103_v33  ;;  %1549 = vmatpush.msrb.mxu1 %v4110_v36 }
 0x4cd   :  { %1346 = vmatpush.msra.mxu0 %v4063_v20  ;;  %1438 = vmatpush.msra.mxu3 %v4065_v21 }
 0x4ce   :  { %1413 = vmatpush.msra.mxu2 %v4119_v39  ;;  %1555 = vmatpush.msrb.mxu1 %v4114_v37 }
 0x4cf   :  { %1349 = vmatpush.msra.mxu0 %v4079_v25 }
 0x4d0   :  { %1561 = vmatpush.msrb.mxu1 %v4126_v42 }
 0x4d1   :  { %1352 = vmatpush.msra.mxu0 %v4092_v29 }
 0x4d2   :  { %1225 = vmatmul.f32.vlgmr.msrb.gmra.mxu0 %v1089_v57  ;;  %1567 = vmatpush.msrb.mxu1 %v4134_v45 }
 0x4d3   :  { %1516 = vmatpush.msrb.mxu0 %v4031_v3 }
 0x4d5   :  { %1518 = vmatpush.msrb.mxu0 %v4033_v4 }
 0x4d7   :  { %1520 = vmatpush.msrb.mxu0 %v4035_v5 }
 0x4d9   :  { %1522 = vmatpush.msrb.mxu0 %v4037_v9 }
 0x4e9   :  { %v1256_v62 = vpop.permute.xlu0 %1255 }
 0x4ea   :  { %v1257_v63 = vsel %vm200_vm1, %v1256_v62, 0 }
 0x4eb   :  { %v1279_v0 = vand.u32 4294901760, %v1257_v63 }
 0x4ed   :  { %v1280_v2 = vsub.f32 %v1257_v63, %v1279_v0  ;;  %1325 = vmatmul.f32.vlgmr.msrb.gmra.mxu3 %v1279_v0  ;;  %v4387_v63 = vld [vmem:[%s154_s21] sm:$0x3] }
 0x4ee   :  { %1616 = vmatpush.msrb.mxu3 %v4031_v3 }
 0x4ef   :  { %v1281_v6 = vand.u32 4294901760, %v1280_v2  ;;  %1355 = vmatmul.f32.vlgmr.msra.gmra.mxu0 %v1280_v2 }
 0x4f0   :  { %1618 = vmatpush.msrb.mxu3 %v4033_v4  ;;  %1645 = vmatpush.msra.mxu0 %v4070_v22 }
 0x4f1   :  { %v1282_v7 = vsub.f32 %v1280_v2, %v1281_v6  ;;  %1382 = vmatmul.f32.vlgmr.msra.gmra.mxu1 %v1281_v6  ;;  %v165_v2 = vrot.slane %v4387_v63, 1  ;;  %v4390_v6 = vld [vmem:[%s158_s22] sm:$0x3] }
 0x4f2   :  { %1620 = vmatpush.msrb.mxu3 %v4035_v5  ;;  %1676 = vmatpush.msra.mxu1 %v4031_v3 }
 0x4f3   :  { %v1283_v12 = vand.u32 4294901760, %v1282_v7  ;;  %1649 = vmatpush.msra.mxu0 %v4073_v23 }
 0x4f4   :  { %1622 = vmatpush.msrb.mxu3 %v4037_v9  ;;  %1678 = vmatpush.msra.mxu1 %v4033_v4 }
 0x4f5   :  { %1284 = vmatmul.f32.vlgmr.msrb.gmra.mxu2 %v1283_v12  ;;  %1440 = vmatmul.f32.vlgmr.msra.gmra.mxu3 %v1279_v0 }
 0x4f6   :  { %1587 = vmatpush.msrb.mxu2 %v4045_v14  ;;  %1680 = vmatpush.msra.mxu1 %v4035_v5 }
 0x4f7   :  { %1653 = vmatpush.msra.mxu0 %v4076_v24  ;;  %1739 = vmatpush.msra.mxu3 %v4122_v41 }
 0x4f8   :  { %1590 = vmatpush.msrb.mxu2 %v4049_v15  ;;  %1682 = vmatpush.msra.mxu1 %v4037_v9 }
 0x4f9   :  { %1657 = vmatpush.msra.mxu0 %v4086_v27  ;;  %1745 = vmatpush.msra.mxu3 %v4130_v44 }
 0x4fa   :  { %1593 = vmatpush.msrb.mxu2 %v4052_v16 }
 0x4fb   :  { %1751 = vmatpush.msra.mxu3 %v4142_v47 }
 0x4fc   :  { %1596 = vmatpush.msrb.mxu2 %v4057_v18 }
 0x4fd   :  { %1415 = vmatmul.f32.vlgmr.msra.gmra.mxu2 %v1279_v0  ;;  %1757 = vmatpush.msra.mxu3 %v4148_v48 }
 0x4fe   :  { %1706 = vmatpush.msra.mxu2 %v4039_v10 }
 0x500   :  { %1708 = vmatpush.msra.mxu2 %v4041_v11 }
 0x502   :  { %1710 = vmatpush.msra.mxu2 %v4054_v17 }
 0x504   :  { %1712 = vmatpush.msra.mxu2 %v4065_v21 }
 0x53f   :  { %v1136_v13 = vpop.f32.mrf.mxu1 }
 0x547   :  { %v1095_v30 = vpop.f32.mrf.mxu0  ;;  %v1166_v35 = vpop.f32.mrf.mxu2 }
 0x548   :  { %v1137_v31 = vadd.f32 %v1136_v13, %v1095_v30  ;;  %v1251_v1 = vpop.f32.mrf.mxu1 }
 0x549   :  { %v1193_v34 = vpop.f32.mrf.mxu3 }
 0x54a   :  { %v1167_v38 = vadd.f32 %v1166_v35, %v1137_v31  ;;  %v167_v31 = vsel %vm82_vm0, %v165_v2, %v4390_v6 }
 0x54c   :  { %v1194_v49 = vadd.f32 %v1193_v34, %v1167_v38 }
 0x54f   :  { %v1226_v52 = vpop.f32.mrf.mxu0 }
 0x550   :  { %v1227_v53 = vadd.f32 %v1226_v52, %v1194_v49 }
 0x552   :  { %v1252_v56 = vadd.f32 %v1251_v1, %v1227_v53 }
 0x554   :  { %v1254_v8 = vadd.f32 %v1252_v56, %v115_v54 }
 0x556   :  { %3811 = vtanh.f32 %v1254_v8  ;;  %v1445_v46 = vmul.f32 0.5, %v1254_v8 }
 0x55c   :  { %v3812_v57 = vpop.eup %3811 }
 0x55d   :  { %1457 = vrot.lane.b32.xlu1 %v3812_v57, %s3991_s16 }
 0x56c   :  { %v1356_v61 = vpop.f32.mrf.mxu0 }
 0x56e   :  { %v1383_v0 = vpop.f32.mrf.mxu1 }
 0x570   :  { %v1326_v58 = vpop.f32.mrf.mxu3 }
 0x578   :  { %v1285_v59 = vpop.f32.mrf.mxu2  ;;  %v1441_v30 = vpop.f32.mrf.mxu3 }
 0x579   :  { %v1327_v60 = vadd.f32 %v1326_v58, %v1285_v59 }
 0x57b   :  { %v1357_v62 = vadd.f32 %v1356_v61, %v1327_v60 }
 0x57d   :  { %v1384_v7 = vadd.f32 %v1383_v0, %v1357_v62 }
 0x580   :  { %v1416_v12 = vpop.f32.mrf.mxu2 }
 0x581   :  { %v1417_v13 = vadd.f32 %v1416_v12, %v1384_v7 }
 0x583   :  { %v1442_v35 = vadd.f32 %v1441_v30, %v1417_v13 }
 0x585   :  { %v1444_v38 = vadd.f32 %v1442_v35, %v167_v31 }
 0x587   :  { %3813 = vtanh.f32 %v1444_v38  ;;  %v1450_v56 = vmul.f32 0.5, %v1444_v38 }
 0x588   :  { %3815 = vtanh.f32 %v1445_v46 }
 0x589   :  { %3817 = vtanh.f32 %v1450_v56 }
 0x58d   :  { %v3814_v34 = vpop.eup %3813 }
 0x58e   :  { %1468 = vrot.lane.b32.xlu2 %v3814_v34, %s3991_s16  ;;  %v3816_v49 = vpop.eup %3815 }
 0x58f   :  { %v1447_v52 = vmul.f32 0.5, %v3816_v49  ;;  %v3818_v57 = vpop.eup %3817 }
 0x590   :  { %v1452_v58 = vmul.f32 0.5, %v3818_v57 }
 0x591   :  { %v1448_v53 = vadd.f32 0.5, %v1447_v52 }
 0x592   :  { %v1453_v59 = vadd.f32 0.5, %v1452_v58 }
 0x593   :  { %v1455_v62 = vmul.f32 %v1448_v53, %v4311_v43 }
 0x594   :  { %v1466_v7 = vmul.f32 %v1453_v59, %v4316_v51 }
 0x5cf   :  { %v1458_v1 = vpop.permute.xlu1 %1457 }
 0x5d0   :  { %v1460_v54 = vmul.f32 %v1458_v1, %v1448_v53 }
 0x5d2   :  { %1462 = vrot.lane.b32.xlu0 %v1460_v54, %s3985_s24 }
 0x5e8   :  { %v1469_v60 = vpop.permute.xlu2 %1468 }
 0x5e9   :  { %v1471_v61 = vmul.f32 %v1469_v60, %v1453_v59 }
 0x5eb   :  { %1473 = vrot.lane.b32.xlu1 %v1471_v61, %s3985_s24 }
 0x644   :  { %v1463_v8 = vpop.permute.xlu0 %1462 }
 0x645   :  { %v4398_v0 = vadd.f32 %v1463_v8, %v1455_v62 }
 0x647   :  { %3819 = vtanh.f32 %v4398_v0 }
 0x64d   :  { %v3820_v2 = vpop.eup %3819 }
 0x64e   :  { %1479 = vrot.lane.b32.xlu2 %v3820_v2, %s3991_s16 }
 0x65d   :  { %v1474_v12 = vpop.permute.xlu1 %1473 }
 0x65e   :  { %v4403_v13 = vadd.f32 %v1474_v12, %v1466_v7 }
 0x660   :  { %3821 = vtanh.f32 %v4403_v13 }
 0x666   :  { %v3822_v30 = vpop.eup %3821 }
 0x667   :  { %1485 = vrot.lane.b32.xlu0 %v3822_v30, %s3991_s16  ;;  %v4466_v30 = vld [vmem:[%s126_s6] sm:$0x3] }
 0x6a8   :  { %v1480_v31 = vpop.permute.xlu2 %1479 }
 0x6a9   :  { %v1482_v43 = vmul.f32 %v1480_v31, %v1448_v53 }
 0x6ab   :  { %1490 = vrot.lane.b32.xlu1 %v1482_v43, %s3985_s24  ;;  %v129_v43 = vrot.slane %v4466_v30, 7 }
 0x6d9   :  { %v1486_v35 = vpop.permute.xlu0 %1485 }
 0x6da   :  { %v4408_v38 = vmul.f32 %v1486_v35, %v1453_v59 }
 0x6dc   :  { %1689 = vrot.lane.b32.xlu2 %v4408_v38, %s3985_s24 }
 0x71d   :  { %v1491_v34 = vpop.permute.xlu1 %1490 }
 0x71e   :  { %3765 = vst.msk [vmem:[%s4847_s3 + $0x4] sm:$0x3] %vm624_vm2, %v1491_v34  ;;  %v1501_v51 = vsel %vm200_vm1, %v1491_v34, 0  ;;  %v4469_v34 = vld [vmem:[%s122_s7] sm:$0x3] }
 0x71f   :  { %v1523_v46 = vand.u32 4294901760, %v1501_v51 }
 0x721   :  { %v1524_v49 = vsub.f32 %v1501_v51, %v1523_v46  ;;  %1569 = vmatmul.f32.vlgmr.msrb.gmra.mxu1 %v1523_v46 }
 0x722   :  { %1806 = vmatpush.msrb.mxu1 %v4039_v10 }
 0x723   :  { %v1525_v52 = vand.u32 4294901760, %v1524_v49  ;;  %1599 = vmatmul.f32.vlgmr.msrb.gmra.mxu2 %v1524_v49 }
 0x724   :  { %1808 = vmatpush.msrb.mxu1 %v4041_v11  ;;  %1835 = vmatpush.msrb.mxu2 %v4083_v26 }
 0x725   :  { %v1526_v53 = vsub.f32 %v1524_v49, %v1525_v52  ;;  %1626 = vmatmul.f32.vlgmr.msrb.gmra.mxu3 %v1525_v52  ;;  %v131_v52 = vsel %vm82_vm0, %v4469_v34, %v129_v43 }
 0x726   :  { %1810 = vmatpush.msrb.mxu1 %v4054_v17  ;;  %1866 = vmatpush.msrb.mxu3 %v4039_v10 }
 0x727   :  { %v1527_v1 = vand.u32 4294901760, %v1526_v53  ;;  %1839 = vmatpush.msrb.mxu2 %v4089_v28 }
 0x728   :  { %1812 = vmatpush.msrb.mxu1 %v4065_v21  ;;  %1868 = vmatpush.msrb.mxu3 %v4041_v11 }
 0x729   :  { %1528 = vmatmul.f32.vlgmr.msrb.gmra.mxu0 %v1527_v1  ;;  %1684 = vmatmul.f32.vlgmr.msra.gmra.mxu1 %v1523_v46 }
 0x72a   :  { %1777 = vmatpush.msrb.mxu0 %v4060_v19  ;;  %1870 = vmatpush.msrb.mxu3 %v4054_v17 }
 0x72b   :  { %1843 = vmatpush.msrb.mxu2 %v4103_v33  ;;  %1983 = vmatpush.msra.mxu1 %v4110_v36 }
 0x72c   :  { %1780 = vmatpush.msrb.mxu0 %v4063_v20  ;;  %1872 = vmatpush.msrb.mxu3 %v4065_v21 }
 0x72d   :  { %1847 = vmatpush.msrb.mxu2 %v4119_v39  ;;  %1989 = vmatpush.msra.mxu1 %v4114_v37 }
 0x72e   :  { %1783 = vmatpush.msrb.mxu0 %v4079_v25 }
 0x72f   :  { %1995 = vmatpush.msra.mxu1 %v4126_v42 }
 0x730   :  { %1786 = vmatpush.msrb.mxu0 %v4092_v29 }
 0x731   :  { %1659 = vmatmul.f32.vlgmr.msra.gmra.mxu0 %v1523_v46  ;;  %2001 = vmatpush.msra.mxu1 %v4134_v45 }
 0x732   :  { %1950 = vmatpush.msra.mxu0 %v4031_v3 }
 0x734   :  { %1952 = vmatpush.msra.mxu0 %v4033_v4 }
 0x736   :  { %v1690_v54 = vpop.permute.xlu2 %1689  ;;  %1954 = vmatpush.msra.mxu0 %v4035_v5 }
 0x737   :  { %v1691_v56 = vsel %vm200_vm1, %v1690_v54, 0 }
 0x738   :  { %v1713_v57 = vand.u32 4294901760, %v1691_v56  ;;  %1956 = vmatpush.msra.mxu0 %v4037_v9 }
 0x73a   :  { %v1714_v58 = vsub.f32 %v1691_v56, %v1713_v57  ;;  %1759 = vmatmul.f32.vlgmr.msra.gmra.mxu3 %v1713_v57 }
 0x73b   :  { %2050 = vmatpush.msra.mxu3 %v4031_v3 }
 0x73c   :  { %v1715_v59 = vand.u32 4294901760, %v1714_v58  ;;  %1789 = vmatmul.f32.vlgmr.msrb.gmra.mxu0 %v1714_v58 }
 0x73d   :  { %2052 = vmatpush.msra.mxu3 %v4033_v4  ;;  %2079 = vmatpush.msrb.mxu0 %v4070_v22 }
 0x73e   :  { %v1716_v60 = vsub.f32 %v1714_v58, %v1715_v59  ;;  %1816 = vmatmul.f32.vlgmr.msrb.gmra.mxu1 %v1715_v59 }
 0x73f   :  { %2054 = vmatpush.msra.mxu3 %v4035_v5  ;;  %2110 = vmatpush.msrb.mxu1 %v4031_v3 }
 0x740   :  { %v1717_v61 = vand.u32 4294901760, %v1716_v60  ;;  %2083 = vmatpush.msrb.mxu0 %v4073_v23 }
 0x741   :  { %2056 = vmatpush.msra.mxu3 %v4037_v9  ;;  %2112 = vmatpush.msrb.mxu1 %v4033_v4 }
 0x742   :  { %1718 = vmatmul.f32.vlgmr.msra.gmra.mxu2 %v1717_v61  ;;  %1874 = vmatmul.f32.vlgmr.msrb.gmra.mxu3 %v1713_v57  ;;  %v4474_v61 = vld [vmem:[%s138_s17] sm:$0x3] }
 0x743   :  { %2021 = vmatpush.msra.mxu2 %v4045_v14  ;;  %2114 = vmatpush.msrb.mxu1 %v4035_v5 }
 0x744   :  { %2087 = vmatpush.msrb.mxu0 %v4076_v24  ;;  %2173 = vmatpush.msrb.mxu3 %v4122_v41 }
 0x745   :  { %2024 = vmatpush.msra.mxu2 %v4049_v15  ;;  %2116 = vmatpush.msrb.mxu1 %v4037_v9 }
 0x746   :  { %2091 = vmatpush.msrb.mxu0 %v4086_v27  ;;  %2179 = vmatpush.msrb.mxu3 %v4130_v44 }
 0x747   :  { %2027 = vmatpush.msra.mxu2 %v4052_v16 }
 0x748   :  { %2185 = vmatpush.msrb.mxu3 %v4142_v47 }
 0x749   :  { %2030 = vmatpush.msra.mxu2 %v4057_v18 }
 0x74a   :  { %1849 = vmatmul.f32.vlgmr.msrb.gmra.mxu2 %v1713_v57  ;;  %2191 = vmatpush.msrb.mxu3 %v4148_v48 }
 0x74b   :  { %2140 = vmatpush.msrb.mxu2 %v4039_v10 }
 0x74d   :  { %2142 = vmatpush.msrb.mxu2 %v4041_v11 }
 0x74f   :  { %2144 = vmatpush.msrb.mxu2 %v4054_v17 }
 0x751   :  { %2146 = vmatpush.msrb.mxu2 %v4065_v21 }
 0x79e   :  { %v1570_v62 = vpop.f32.mrf.mxu1 }
 0x7a6   :  { %v1529_v8 = vpop.f32.mrf.mxu0  ;;  %v1600_v7 = vpop.f32.mrf.mxu2 }
 0x7a7   :  { %v1571_v2 = vadd.f32 %v1570_v62, %v1529_v8  ;;  %v1685_v49 = vpop.f32.mrf.mxu1  ;;  %v149_v8 = vrot.slane %v4474_v61, 1 }
 0x7a8   :  { %v1627_v31 = vpop.f32.mrf.mxu3 }
 0x7a9   :  { %v1601_v12 = vadd.f32 %v1600_v7, %v1571_v2  ;;  %v4477_v2 = vld [vmem:[%s142_s18] sm:$0x3]  ;;  %s3682_s18 = sshll.u32 %s4848_s4, 4  ;;  %s3683_s18 = int_to_ptr.hbm [resolvable:$true] %s3682_s18 }
 0x7ab   :  { %v1628_v35 = vadd.f32 %v1627_v31, %v1601_v12 }
 0x7ae   :  { %v1660_v51 = vpop.f32.mrf.mxu0 }
 0x7af   :  { %v1661_v46 = vadd.f32 %v1660_v51, %v1628_v35  ;;  %v151_v35 = vsel %vm82_vm0, %v149_v8, %v4477_v2 }
 0x7b1   :  { %v1686_v53 = vadd.f32 %v1685_v49, %v1661_v46 }
 0x7b3   :  { %v1688_v1 = vadd.f32 %v1686_v53, %v131_v52 }
 0x7b5   :  { %3823 = vtanh.f32 %v1688_v1  ;;  %v1879_v52 = vmul.f32 0.5, %v1688_v1 }
 0x7b9   :  { %v1790_v59 = vpop.f32.mrf.mxu0 }
 0x7bb   :  { %v3824_v54 = vpop.eup %3823  ;;  %v1817_v62 = vpop.f32.mrf.mxu1 }
 0x7bc   :  { %1891 = vrot.lane.b32.xlu0 %v3824_v54, %s3991_s16 }
 0x7bd   :  { %v1760_v56 = vpop.f32.mrf.mxu3 }
 0x7c5   :  { %v1719_v57 = vpop.f32.mrf.mxu2  ;;  %v1875_v43 = vpop.f32.mrf.mxu3 }
 0x7c6   :  { %v1761_v58 = vadd.f32 %v1760_v56, %v1719_v57 }
 0x7c8   :  { %v1791_v60 = vadd.f32 %v1790_v59, %v1761_v58 }
 0x7ca   :  { %v1818_v7 = vadd.f32 %v1817_v62, %v1791_v60 }
 0x7cd   :  { %v1850_v12 = vpop.f32.mrf.mxu2 }
 0x7ce   :  { %v1851_v31 = vadd.f32 %v1850_v12, %v1818_v7 }
 0x7d0   :  { %v1876_v51 = vadd.f32 %v1875_v43, %v1851_v31 }
 0x7d2   :  { %v1878_v46 = vadd.f32 %v1876_v51, %v151_v35 }
 0x7d4   :  { %3825 = vtanh.f32 %v1878_v46  ;;  %v1884_v59 = vmul.f32 0.5, %v1878_v46 }
 0x7d5   :  { %3827 = vtanh.f32 %v1879_v52 }
 0x7d6   :  { %3829 = vtanh.f32 %v1884_v59 }
 0x7da   :  { %v3826_v49 = vpop.eup %3825 }
 0x7db   :  { %1902 = vrot.lane.b32.xlu1 %v3826_v49, %s3991_s16  ;;  %v3828_v53 = vpop.eup %3827 }
 0x7dc   :  { %v1881_v54 = vmul.f32 0.5, %v3828_v53  ;;  %v3830_v60 = vpop.eup %3829 }
 0x7dd   :  { %v1886_v62 = vmul.f32 0.5, %v3830_v60 }
 0x7de   :  { %v1882_v56 = vadd.f32 0.5, %v1881_v54 }
 0x7df   :  { %v1887_v8 = vadd.f32 0.5, %v1886_v62 }
 0x7e0   :  { %v1889_v31 = vmul.f32 %v1882_v56, %v4398_v0 }
 0x7e1   :  { %v1900_v51 = vmul.f32 %v1887_v8, %v4403_v13 }
 0x82e   :  { %v1892_v57 = vpop.permute.xlu0 %1891 }
 0x82f   :  { %v1894_v58 = vmul.f32 %v1892_v57, %v1882_v56 }
 0x831   :  { %1896 = vrot.lane.b32.xlu2 %v1894_v58, %s3985_s24 }
 0x84d   :  { %v1903_v7 = vpop.permute.xlu1 %1902 }
 0x84e   :  { %v1905_v12 = vmul.f32 %v1903_v7, %v1887_v8 }
 0x850   :  { %1907 = vrot.lane.b32.xlu0 %v1905_v12, %s3985_s24 }
 0x88b   :  { %v1897_v1 = vpop.permute.xlu2 %1896 }
 0x88c   :  { %v4485_v43 = vadd.f32 %v1897_v1, %v1889_v31 }
 0x88e   :  { %3831 = vtanh.f32 %v4485_v43 }
 0x894   :  { %v3832_v35 = vpop.eup %3831 }
 0x895   :  { %1913 = vrot.lane.b32.xlu1 %v3832_v35, %s3991_s16 }
 0x8c2   :  { %v1908_v46 = vpop.permute.xlu0 %1907 }
 0x8c3   :  { %v4490_v49 = vadd.f32 %v1908_v46, %v1900_v51 }
 0x8c5   :  { %3833 = vtanh.f32 %v4490_v49 }
 0x8cb   :  { %v3834_v52 = vpop.eup %3833 }
 0x8cc   :  { %1919 = vrot.lane.b32.xlu2 %v3834_v52, %s3991_s16 }
 0x907   :  { %v1914_v53 = vpop.permute.xlu1 %1913 }
 0x908   :  { %v1916_v0 = vmul.f32 %v1914_v53, %v1882_v56 }
 0x90a   :  { %1924 = vrot.lane.b32.xlu0 %v1916_v0, %s3985_s24 }
 0x926   :  { %v1920_v54 = vpop.permute.xlu2 %1919 }
 0x927   :  { %v4495_v57 = vmul.f32 %v1920_v54, %v1887_v8 }
 0x929   :  { %2123 = vrot.lane.b32.xlu1 %v4495_v57, %s3985_s24 }
 0x97c   :  { %v1925_v58 = vpop.permute.xlu0 %1924 }
 0x97d   :  { %3767 = vst.msk [vmem:[%s4847_s3 + $0x6] sm:$0x3] %vm624_vm2, %v1925_v58  ;;  %v1935_v13 = vsel %vm200_vm1, %v1925_v58, 0 }
 0x97e   :  { %v1957_v59 = vand.u32 4294901760, %v1935_v13 }
 0x980   :  { %v1958_v60 = vsub.f32 %v1935_v13, %v1957_v59  ;;  %2003 = vmatmul.f32.vlgmr.msra.gmra.mxu1 %v1957_v59  ;;  %v145_v13 = vrot.slane %v4477_v2, 7  ;;  %v133_v2 = vrot.slane %v4469_v34, 1 }
 0x981   :  { %2240 = vmatpush.msra.mxu1 %v4039_v10 }
 0x982   :  { %v1959_v56 = vand.u32 4294901760, %v1958_v60  ;;  %2033 = vmatmul.f32.vlgmr.msra.gmra.mxu2 %v1958_v60 }
 0x983   :  { %2242 = vmatpush.msra.mxu1 %v4041_v11  ;;  %2269 = vmatpush.msra.mxu2 %v4083_v26 }
 0x984   :  { %v1960_v62 = vsub.f32 %v1958_v60, %v1959_v56  ;;  %2060 = vmatmul.f32.vlgmr.msra.gmra.mxu3 %v1959_v56 }
 0x985   :  { %2244 = vmatpush.msra.mxu1 %v4054_v17  ;;  %2300 = vmatpush.msra.mxu3 %v4039_v10 }
 0x986   :  { %v1961_v8 = vand.u32 4294901760, %v1960_v62  ;;  %2273 = vmatpush.msra.mxu2 %v4089_v28 }
 0x987   :  { %2246 = vmatpush.msra.mxu1 %v4065_v21  ;;  %2302 = vmatpush.msra.mxu3 %v4041_v11 }
 0x988   :  { %1962 = vmatmul.f32.vlgmr.msra.gmra.mxu0 %v1961_v8  ;;  %2118 = vmatmul.f32.vlgmr.msrb.gmra.mxu1 %v1957_v59 }
 0x989   :  { %2211 = vmatpush.msra.mxu0 %v4060_v19  ;;  %2304 = vmatpush.msra.mxu3 %v4054_v17 }
 0x98a   :  { %2277 = vmatpush.msra.mxu2 %v4103_v33  ;;  %2415 = vmatpush.msrb.mxu1 %v4110_v36 }
 0x98b   :  { %2214 = vmatpush.msra.mxu0 %v4063_v20  ;;  %2306 = vmatpush.msra.mxu3 %v4065_v21 }
 0x98c   :  { %2281 = vmatpush.msra.mxu2 %v4119_v39  ;;  %2421 = vmatpush.msrb.mxu1 %v4114_v37 }
 0x98d   :  { %2217 = vmatpush.msra.mxu0 %v4079_v25 }
 0x98e   :  { %2427 = vmatpush.msrb.mxu1 %v4126_v42 }
 0x98f   :  { %2220 = vmatpush.msra.mxu0 %v4092_v29 }
 0x990   :  { %2093 = vmatmul.f32.vlgmr.msrb.gmra.mxu0 %v1957_v59  ;;  %2433 = vmatpush.msrb.mxu1 %v4134_v45 }
 0x991   :  { %2382 = vmatpush.msrb.mxu0 %v4031_v3 }
 0x993   :  { %2384 = vmatpush.msrb.mxu0 %v4033_v4 }
 0x995   :  { %2386 = vmatpush.msrb.mxu0 %v4035_v5 }
 0x997   :  { %2388 = vmatpush.msrb.mxu0 %v4037_v9 }
 0x99b   :  { %v2124_v7 = vpop.permute.xlu1 %2123 }
 0x99c   :  { %v2125_v12 = vsel %vm200_vm1, %v2124_v7, 0  ;;  %v147_v7 = vsel %vm82_vm0, %v4474_v61, %v145_v13  ;;  %v135_v61 = vsel %vm82_vm0, %v133_v2, %v4466_v30 }
 0x99d   :  { %v2147_v31 = vand.u32 4294901760, %v2125_v12 }
 0x99f   :  { %v2148_v1 = vsub.f32 %v2125_v12, %v2147_v31  ;;  %2193 = vmatmul.f32.vlgmr.msrb.gmra.mxu3 %v2147_v31 }
 0x9a0   :  { %2482 = vmatpush.msrb.mxu3 %v4031_v3 }
 0x9a1   :  { %v2149_v35 = vand.u32 4294901760, %v2148_v1  ;;  %2223 = vmatmul.f32.vlgmr.msra.gmra.mxu0 %v2148_v1 }
 0x9a2   :  { %2484 = vmatpush.msrb.mxu3 %v4033_v4  ;;  %2511 = vmatpush.msra.mxu0 %v4070_v22 }
 0x9a3   :  { %v2150_v51 = vsub.f32 %v2148_v1, %v2149_v35  ;;  %2250 = vmatmul.f32.vlgmr.msra.gmra.mxu1 %v2149_v35 }
 0x9a4   :  { %2486 = vmatpush.msrb.mxu3 %v4035_v5  ;;  %2542 = vmatpush.msra.mxu1 %v4031_v3 }
 0x9a5   :  { %v2151_v46 = vand.u32 4294901760, %v2150_v51  ;;  %2515 = vmatpush.msra.mxu0 %v4073_v23 }
 0x9a6   :  { %2488 = vmatpush.msrb.mxu3 %v4037_v9  ;;  %2544 = vmatpush.msra.mxu1 %v4033_v4 }
 0x9a7   :  { %2152 = vmatmul.f32.vlgmr.msrb.gmra.mxu2 %v2151_v46  ;;  %2308 = vmatmul.f32.vlgmr.msra.gmra.mxu3 %v2147_v31 }
 0x9a8   :  { %2453 = vmatpush.msrb.mxu2 %v4045_v14  ;;  %2546 = vmatpush.msra.mxu1 %v4035_v5 }
 0x9a9   :  { %2519 = vmatpush.msra.mxu0 %v4076_v24  ;;  %2605 = vmatpush.msra.mxu3 %v4122_v41 }
 0x9aa   :  { %2456 = vmatpush.msrb.mxu2 %v4049_v15  ;;  %2548 = vmatpush.msra.mxu1 %v4037_v9 }
 0x9ab   :  { %2523 = vmatpush.msra.mxu0 %v4086_v27  ;;  %2611 = vmatpush.msra.mxu3 %v4130_v44 }
 0x9ac   :  { %2459 = vmatpush.msrb.mxu2 %v4052_v16 }
 0x9ad   :  { %2617 = vmatpush.msra.mxu3 %v4142_v47 }
 0x9ae   :  { %2462 = vmatpush.msrb.mxu2 %v4057_v18 }
 0x9af   :  { %2283 = vmatmul.f32.vlgmr.msra.gmra.mxu2 %v2147_v31  ;;  %2623 = vmatpush.msra.mxu3 %v4148_v48 }
 0x9b0   :  { %2572 = vmatpush.msra.mxu2 %v4039_v10 }
 0x9b2   :  { %2574 = vmatpush.msra.mxu2 %v4041_v11 }
 0x9b4   :  { %2576 = vmatpush.msra.mxu2 %v4054_v17 }
 0x9b6   :  { %2578 = vmatpush.msra.mxu2 %v4065_v21 }
 0x9fd   :  { %v2004_v52 = vpop.f32.mrf.mxu1 }
 0xa05   :  { %v1963_v53 = vpop.f32.mrf.mxu0  ;;  %v2034_v54 = vpop.f32.mrf.mxu2 }
 0xa06   :  { %v2005_v0 = vadd.f32 %v2004_v52, %v1963_v53  ;;  %v2119_v8 = vpop.f32.mrf.mxu1 }
 0xa07   :  { %v2061_v59 = vpop.f32.mrf.mxu3 }
 0xa08   :  { %v2035_v58 = vadd.f32 %v2034_v54, %v2005_v0 }
 0xa0a   :  { %v2062_v60 = vadd.f32 %v2061_v59, %v2035_v58 }
 0xa0d   :  { %v2094_v56 = vpop.f32.mrf.mxu0 }
 0xa0e   :  { %v2095_v62 = vadd.f32 %v2094_v56, %v2062_v60 }
 0xa10   :  { %v2120_v12 = vadd.f32 %v2119_v8, %v2095_v62 }
 0xa12   :  { %v2122_v31 = vadd.f32 %v2120_v12, %v147_v7 }
 0xa14   :  { %3835 = vtanh.f32 %v2122_v31  ;;  %v2313_v8 = vmul.f32 0.5, %v2122_v31 }
 0xa1a   :  { %v3836_v1 = vpop.eup %3835 }
 0xa1b   :  { %2325 = vrot.lane.b32.xlu2 %v3836_v1, %s3991_s16 }
 0xa1e   :  { %v2224_v52 = vpop.f32.mrf.mxu0 }
 0xa20   :  { %v2251_v0 = vpop.f32.mrf.mxu1 }
 0xa22   :  { %v2194_v35 = vpop.f32.mrf.mxu3 }
 0xa2a   :  { %v2153_v51 = vpop.f32.mrf.mxu2  ;;  %v2309_v60 = vpop.f32.mrf.mxu3 }
 0xa2b   :  { %v2195_v46 = vadd.f32 %v2194_v35, %v2153_v51 }
 0xa2d   :  { %v2225_v53 = vadd.f32 %v2224_v52, %v2195_v46 }
 0xa2f   :  { %v2252_v54 = vadd.f32 %v2251_v0, %v2225_v53 }
 0xa32   :  { %v2284_v58 = vpop.f32.mrf.mxu2 }
 0xa33   :  { %v2285_v59 = vadd.f32 %v2284_v58, %v2252_v54 }
 0xa35   :  { %v2310_v13 = vadd.f32 %v2309_v60, %v2285_v59 }
 0xa37   :  { %v2312_v56 = vadd.f32 %v2310_v13, %v135_v61 }
 0xa39   :  { %3837 = vtanh.f32 %v2312_v56  ;;  %v2318_v51 = vmul.f32 0.5, %v2312_v56 }
 0xa3a   :  { %3839 = vtanh.f32 %v2313_v8 }
 0xa3b   :  { %3841 = vtanh.f32 %v2318_v51 }
 0xa3f   :  { %v3838_v62 = vpop.eup %3837 }
 0xa40   :  { %2336 = vrot.lane.b32.xlu0 %v3838_v62, %s3991_s16  ;;  %v3840_v7 = vpop.eup %3839 }
 0xa41   :  { %v2315_v12 = vmul.f32 0.5, %v3840_v7  ;;  %v3842_v46 = vpop.eup %3841 }
 0xa42   :  { %v2320_v52 = vmul.f32 0.5, %v3842_v46 }
 0xa43   :  { %v2316_v1 = vadd.f32 0.5, %v2315_v12 }
 0xa44   :  { %v2321_v30 = vadd.f32 0.5, %v2320_v52 }
 0xa45   :  { %v2323_v0 = vmul.f32 %v2316_v1, %v4485_v43 }
 0xa46   :  { %v2334_v59 = vmul.f32 %v2321_v30, %v4490_v49 }
 0xa75   :  { %v2326_v34 = vpop.permute.xlu2 %2325 }
 0xa76   :  { %v2328_v35 = vmul.f32 %v2326_v34, %v2316_v1 }
 0xa78   :  { %2330 = vrot.lane.b32.xlu1 %v2328_v35, %s3985_s24 }
 0xab2   :  { %v2337_v53 = vpop.permute.xlu0 %2336 }
 0xab3   :  { %v2339_v2 = vmul.f32 %v2337_v53, %v2321_v30 }
 0xab5   :  { %2341 = vrot.lane.b32.xlu2 %v2339_v2, %s3985_s24 }
 0xaea   :  { %v2331_v31 = vpop.permute.xlu1 %2330 }
 0xaeb   :  { %v4564_v54 = vadd.f32 %v2331_v31, %v2323_v0 }
 0xaed   :  { %3843 = vtanh.f32 %v4564_v54 }
 0xaf3   :  { %v3844_v58 = vpop.eup %3843 }
 0xaf4   :  { %2347 = vrot.lane.b32.xlu0 %v3844_v58, %s3991_s16 }
 0xb0f   :  { %v2342_v60 = vpop.permute.xlu2 %2341 }
 0xb10   :  { %v4569_v61 = vadd.f32 %v2342_v60, %v2334_v59 }
 0xb12   :  { %3845 = vtanh.f32 %v4569_v61 }
 0xb18   :  { %v3846_v13 = vpop.eup %3845 }
 0xb19   :  { %2353 = vrot.lane.b32.xlu1 %v3846_v13, %s3991_s16 }
 0xb66   :  { %v2348_v56 = vpop.permute.xlu0 %2347 }
 0xb67   :  { %v2350_v43 = vmul.f32 %v2348_v56, %v2316_v1 }
 0xb69   :  { %2358 = vrot.lane.b32.xlu2 %v2350_v43, %s3985_s24  ;;  %v161_v43 = vrot.slane %v4390_v6, 7  ;;  %v117_v6 = vrot.slane %v4382_v50, 1 }
 0xb8b   :  { %v2354_v62 = vpop.permute.xlu1 %2353 }
 0xb8c   :  { %v4574_v8 = vmul.f32 %v2354_v62, %v2321_v30 }
 0xb8e   :  { %2555 = vrot.lane.b32.xlu0 %v4574_v8, %s3985_s24 }
 0xbc3   :  { %v4578_v7 = vpop.permute.xlu2 %2358 }
 0xbc4   :  { %v2367_v49 = vsel %vm200_vm1, %v4578_v7, 0 }
 0xbc5   :  { %v2389_v12 = vand.u32 4294901760, %v2367_v49 }
 0xbc7   :  { %v2390_v34 = vsub.f32 %v2367_v49, %v2389_v12  ;;  %2435 = vmatmul.f32.vlgmr.msrb.gmra.mxu1 %v2389_v12 }
 0xbc8   :  { %2672 = vmatpush.msrb.mxu1 %v4039_v10 }
 0xbc9   :  { %v2391_v35 = vand.u32 4294901760, %v2390_v34  ;;  %2465 = vmatmul.f32.vlgmr.msrb.gmra.mxu2 %v2390_v34 }
 0xbca   :  { %2674 = vmatpush.msrb.mxu1 %v4041_v11  ;;  %2701 = vmatpush.msrb.mxu2 %v4083_v26 }
 0xbcb   :  { %v2392_v1 = vsub.f32 %v2390_v34, %v2391_v35  ;;  %2492 = vmatmul.f32.vlgmr.msrb.gmra.mxu3 %v2391_v35 }
 0xbcc   :  { %2676 = vmatpush.msrb.mxu1 %v4054_v17  ;;  %2732 = vmatpush.msrb.mxu3 %v4039_v10 }
 0xbcd   :  { %v2393_v51 = vand.u32 4294901760, %v2392_v1  ;;  %2705 = vmatpush.msrb.mxu2 %v4089_v28  ;;  %v163_v1 = vsel %vm82_vm0, %v4387_v63, %v161_v43  ;;  %v119_v63 = vsel %vm82_vm0, %v117_v6, %v4379_v40 }
 0xbce   :  { %2678 = vmatpush.msrb.mxu1 %v4065_v21  ;;  %2734 = vmatpush.msrb.mxu3 %v4041_v11 }
 0xbcf   :  { %2394 = vmatmul.f32.vlgmr.msrb.gmra.mxu0 %v2393_v51  ;;  %2550 = vmatmul.f32.vlgmr.msra.gmra.mxu1 %v2389_v12 }
 0xbd0   :  { %2643 = vmatpush.msrb.mxu0 %v4060_v19  ;;  %2736 = vmatpush.msrb.mxu3 %v4054_v17 }
 0xbd1   :  { %2709 = vmatpush.msrb.mxu2 %v4103_v33  ;;  %2847 = vmatpush.msra.mxu1 %v4110_v36 }
 0xbd2   :  { %2646 = vmatpush.msrb.mxu0 %v4063_v20  ;;  %2738 = vmatpush.msrb.mxu3 %v4065_v21 }
 0xbd3   :  { %2713 = vmatpush.msrb.mxu2 %v4119_v39  ;;  %2853 = vmatpush.msra.mxu1 %v4114_v37 }
 0xbd4   :  { %2649 = vmatpush.msrb.mxu0 %v4079_v25 }
 0xbd5   :  { %2859 = vmatpush.msra.mxu1 %v4126_v42 }
 0xbd6   :  { %2652 = vmatpush.msrb.mxu0 %v4092_v29 }
 0xbd7   :  { %2525 = vmatmul.f32.vlgmr.msra.gmra.mxu0 %v2389_v12  ;;  %2865 = vmatpush.msra.mxu1 %v4134_v45 }
 0xbd8   :  { %2814 = vmatpush.msra.mxu0 %v4031_v3 }
 0xbda   :  { %2816 = vmatpush.msra.mxu0 %v4033_v4 }
 0xbdc   :  { %2818 = vmatpush.msra.mxu0 %v4035_v5 }
 0xbde   :  { %2820 = vmatpush.msra.mxu0 %v4037_v9 }
 0xc00   :  { %v2556_v46 = vpop.permute.xlu0 %2555 }
 0xc01   :  { %v2557_v52 = vsel %vm200_vm1, %v2556_v46, 0 }
 0xc02   :  { %v2579_v30 = vand.u32 4294901760, %v2557_v52 }
 0xc04   :  { %v2580_v53 = vsub.f32 %v2557_v52, %v2579_v30  ;;  %2625 = vmatmul.f32.vlgmr.msra.gmra.mxu3 %v2579_v30 }
 0xc05   :  { %2914 = vmatpush.msra.mxu3 %v4031_v3 }
 0xc06   :  { %v2581_v2 = vand.u32 4294901760, %v2580_v53  ;;  %2655 = vmatmul.f32.vlgmr.msrb.gmra.mxu0 %v2580_v53 }
 0xc07   :  { %2916 = vmatpush.msra.mxu3 %v4033_v4  ;;  %2943 = vmatpush.msrb.mxu0 %v4070_v22 }
 0xc08   :  { %v2582_v0 = vsub.f32 %v2580_v53, %v2581_v2  ;;  %2682 = vmatmul.f32.vlgmr.msrb.gmra.mxu1 %v2581_v2 }
 0xc09   :  { %2918 = vmatpush.msra.mxu3 %v4035_v5  ;;  %2974 = vmatpush.msrb.mxu1 %v4031_v3 }
 0xc0a   :  { %v2583_v31 = vand.u32 4294901760, %v2582_v0  ;;  %2947 = vmatpush.msrb.mxu0 %v4073_v23 }
 0xc0b   :  { %2920 = vmatpush.msra.mxu3 %v4037_v9  ;;  %2976 = vmatpush.msrb.mxu1 %v4033_v4 }
 0xc0c   :  { %2584 = vmatmul.f32.vlgmr.msra.gmra.mxu2 %v2583_v31  ;;  %2740 = vmatmul.f32.vlgmr.msrb.gmra.mxu3 %v2579_v30 }
 0xc0d   :  { %2885 = vmatpush.msra.mxu2 %v4045_v14  ;;  %2978 = vmatpush.msrb.mxu1 %v4035_v5 }
 0xc0e   :  { %2951 = vmatpush.msrb.mxu0 %v4076_v24  ;;  %3037 = vmatpush.msrb.mxu3 %v4122_v41 }
 0xc0f   :  { %2888 = vmatpush.msra.mxu2 %v4049_v15  ;;  %2980 = vmatpush.msrb.mxu1 %v4037_v9 }
 0xc10   :  { %2955 = vmatpush.msrb.mxu0 %v4086_v27  ;;  %3043 = vmatpush.msrb.mxu3 %v4130_v44 }
 0xc11   :  { %2891 = vmatpush.msra.mxu2 %v4052_v16 }
 0xc12   :  { %3049 = vmatpush.msrb.mxu3 %v4142_v47 }
 0xc13   :  { %2894 = vmatpush.msra.mxu2 %v4057_v18 }
 0xc14   :  { %2715 = vmatmul.f32.vlgmr.msrb.gmra.mxu2 %v2579_v30  ;;  %3055 = vmatpush.msrb.mxu3 %v4148_v48 }
 0xc15   :  { %3004 = vmatpush.msrb.mxu2 %v4039_v10 }
 0xc17   :  { %3006 = vmatpush.msrb.mxu2 %v4041_v11 }
 0xc19   :  { %3008 = vmatpush.msrb.mxu2 %v4054_v17 }
 0xc1b   :  { %3010 = vmatpush.msrb.mxu2 %v4065_v21 }
 0xc44   :  { %v2436_v58 = vpop.f32.mrf.mxu1 }
 0xc4c   :  { %v2395_v59 = vpop.f32.mrf.mxu0  ;;  %v2466_v13 = vpop.f32.mrf.mxu2 }
 0xc4d   :  { %v2437_v60 = vadd.f32 %v2436_v58, %v2395_v59  ;;  %v2551_v35 = vpop.f32.mrf.mxu1 }
 0xc4e   :  { %v2493_v62 = vpop.f32.mrf.mxu3 }
 0xc4f   :  { %v2467_v56 = vadd.f32 %v2466_v13, %v2437_v60 }
 0xc51   :  { %v2494_v49 = vadd.f32 %v2493_v62, %v2467_v56 }
 0xc54   :  { %v2526_v12 = vpop.f32.mrf.mxu0 }
 0xc55   :  { %v2527_v34 = vadd.f32 %v2526_v12, %v2494_v49 }
 0xc57   :  { %v2552_v51 = vadd.f32 %v2551_v35, %v2527_v34 }
 0xc59   :  { %v2554_v46 = vadd.f32 %v2552_v51, %v163_v1 }
 0xc5b   :  { %3847 = vtanh.f32 %v2554_v46  ;;  %v2745_v12 = vmul.f32 0.5, %v2554_v46 }
 0xc61   :  { %v3848_v52 = vpop.eup %3847 }
 0xc62   :  { %2757 = vrot.lane.b32.xlu1 %v3848_v52, %s3991_s16 }
 0xc83   :  { %v2656_v0 = vpop.f32.mrf.mxu0 }
 0xc85   :  { %v2683_v58 = vpop.f32.mrf.mxu1 }
 0xc87   :  { %v2626_v30 = vpop.f32.mrf.mxu3 }
 0xc8f   :  { %v2585_v53 = vpop.f32.mrf.mxu2  ;;  %v2741_v56 = vpop.f32.mrf.mxu3 }
 0xc90   :  { %v2627_v2 = vadd.f32 %v2626_v30, %v2585_v53 }
 0xc92   :  { %v2657_v31 = vadd.f32 %v2656_v0, %v2627_v2 }
 0xc94   :  { %v2684_v59 = vadd.f32 %v2683_v58, %v2657_v31 }
 0xc97   :  { %v2716_v60 = vpop.f32.mrf.mxu2 }
 0xc98   :  { %v2717_v13 = vadd.f32 %v2716_v60, %v2684_v59 }
 0xc9a   :  { %v2742_v43 = vadd.f32 %v2741_v56, %v2717_v13 }
 0xc9c   :  { %v2744_v62 = vadd.f32 %v2742_v43, %v119_v63 }
 0xc9e   :  { %3849 = vtanh.f32 %v2744_v62  ;;  %v2750_v52 = vmul.f32 0.5, %v2744_v62 }
 0xc9f   :  { %3851 = vtanh.f32 %v2745_v12 }
 0xca0   :  { %3853 = vtanh.f32 %v2750_v52 }
 0xca4   :  { %v3850_v49 = vpop.eup %3849 }
 0xca5   :  { %2768 = vrot.lane.b32.xlu2 %v3850_v49, %s3991_s16  ;;  %v3852_v34 = vpop.eup %3851 }
 0xca6   :  { %v2747_v35 = vmul.f32 0.5, %v3852_v34  ;;  %v3854_v30 = vpop.eup %3853 }
 0xca7   :  { %v2752_v53 = vmul.f32 0.5, %v3854_v30 }
 0xca8   :  { %v2748_v1 = vadd.f32 0.5, %v2747_v35 }
 0xca9   :  { %v2753_v40 = vadd.f32 0.5, %v2752_v53 }
 0xcaa   :  { %v2755_v31 = vmul.f32 %v2748_v1, %v4564_v54 }
 0xcab   :  { %v2766_v59 = vmul.f32 %v2753_v40, %v4569_v61 }
 0xcd4   :  { %v2758_v50 = vpop.permute.xlu1 %2757 }
 0xcd5   :  { %v2760_v51 = vmul.f32 %v2758_v50, %v2748_v1 }
 0xcd7   :  { %2762 = vrot.lane.b32.xlu0 %v2760_v51, %s3985_s24 }
 0xcff   :  { %v2769_v2 = vpop.permute.xlu2 %2768 }
 0xd00   :  { %v2771_v0 = vmul.f32 %v2769_v2, %v2753_v40 }
 0xd02   :  { %2773 = vrot.lane.b32.xlu1 %v2771_v0, %s3985_s24 }
 0xd49   :  { %v2763_v46 = vpop.permute.xlu0 %2762 }
 0xd4a   :  { %v4642_v6 = vadd.f32 %v2763_v46, %v2755_v31 }
 0xd4c   :  { %3855 = vtanh.f32 %v4642_v6 }
 0xd52   :  { %v3856_v58 = vpop.eup %3855 }
 0xd53   :  { %2779 = vrot.lane.b32.xlu2 %v3856_v58, %s3991_s16  ;;  %v3885_v58 = vld [vmem:[%s4295_s26] sm:$0x3] }
 0xd74   :  { %v2774_v60 = vpop.permute.xlu1 %2773 }
 0xd75   :  { %v4647_v13 = vadd.f32 %v2774_v60, %v2766_v59  ;;  %v101_v59 = vrot.slane %v3885_v58, 1 }
 0xd77   :  { %3857 = vtanh.f32 %v4647_v13 }
 0xd7d   :  { %v3858_v56 = vpop.eup %3857 }
 0xd7e   :  { %2785 = vrot.lane.b32.xlu0 %v3858_v56, %s3991_s16 }
 0xdad   :  { %v2780_v63 = vpop.permute.xlu2 %2779 }
 0xdae   :  { %v2782_v54 = vmul.f32 %v2780_v63, %v2748_v1 }
 0xdb0   :  { %2790 = vrot.lane.b32.xlu1 %v2782_v54, %s3985_s24 }
 0xdf0   :  { %v2786_v43 = vpop.permute.xlu0 %2785 }
 0xdf1   :  { %v4652_v62 = vmul.f32 %v2786_v43, %v2753_v40 }
 0xdf3   :  { %2987 = vrot.lane.b32.xlu2 %v4652_v62, %s3985_s24 }
 0xe22   :  { %v4656_v49 = vpop.permute.xlu1 %2790 }
 0xe23   :  { %v2799_v61 = vsel %vm200_vm1, %v4656_v49, 0 }
 0xe24   :  { %v2821_v12 = vand.u32 4294901760, %v2799_v61 }
 0xe26   :  { %v2822_v34 = vsub.f32 %v2799_v61, %v2821_v12  ;;  %2867 = vmatmul.f32.vlgmr.msra.gmra.mxu1 %v2821_v12  ;;  %v3886_v61 = vld [vmem:[%s4292_s23] sm:$0x3] }
 0xe27   :  { %3104 = vmatpush.msra.mxu1 %v4039_v10 }
 0xe28   :  { %v2823_v35 = vand.u32 4294901760, %v2822_v34  ;;  %2897 = vmatmul.f32.vlgmr.msra.gmra.mxu2 %v2822_v34 }
 0xe29   :  { %3106 = vmatpush.msra.mxu1 %v4041_v11  ;;  %3133 = vmatpush.msra.mxu2 %v4083_v26 }
 0xe2a   :  { %v2824_v1 = vsub.f32 %v2822_v34, %v2823_v35  ;;  %2924 = vmatmul.f32.vlgmr.msra.gmra.mxu3 %v2823_v35 }
 0xe2b   :  { %3108 = vmatpush.msra.mxu1 %v4054_v17  ;;  %3164 = vmatpush.msra.mxu3 %v4039_v10 }
 0xe2c   :  { %v2825_v50 = vand.u32 4294901760, %v2824_v1  ;;  %3137 = vmatpush.msra.mxu2 %v4089_v28 }
 0xe2d   :  { %3110 = vmatpush.msra.mxu1 %v4065_v21  ;;  %3166 = vmatpush.msra.mxu3 %v4041_v11 }
 0xe2e   :  { %2826 = vmatmul.f32.vlgmr.msra.gmra.mxu0 %v2825_v50  ;;  %2982 = vmatmul.f32.vlgmr.msrb.gmra.mxu1 %v2821_v12 }
 0xe2f   :  { %3075 = vmatpush.msra.mxu0 %v4060_v19  ;;  %3168 = vmatpush.msra.mxu3 %v4054_v17 }
 0xe30   :  { %3141 = vmatpush.msra.mxu2 %v4103_v33  ;;  %3279 = vmatpush.msrb.mxu1 %v4110_v36 }
 0xe31   :  { %3078 = vmatpush.msra.mxu0 %v4063_v20  ;;  %3170 = vmatpush.msra.mxu3 %v4065_v21 }
 0xe32   :  { %3145 = vmatpush.msra.mxu2 %v4119_v39  ;;  %3285 = vmatpush.msrb.mxu1 %v4114_v37 }
 0xe33   :  { %3081 = vmatpush.msra.mxu0 %v4079_v25 }
 0xe34   :  { %3291 = vmatpush.msrb.mxu1 %v4126_v42 }
 0xe35   :  { %3084 = vmatpush.msra.mxu0 %v4092_v29 }
 0xe36   :  { %2957 = vmatmul.f32.vlgmr.msrb.gmra.mxu0 %v2821_v12  ;;  %3297 = vmatpush.msrb.mxu1 %v4134_v45  ;;  %v103_v12 = vsel %vm82_vm0, %v101_v59, %v3886_v61 }
 0xe37   :  { %3246 = vmatpush.msrb.mxu0 %v4031_v3 }
 0xe39   :  { %3248 = vmatpush.msrb.mxu0 %v4033_v4 }
 0xe3b   :  { %3250 = vmatpush.msrb.mxu0 %v4035_v5 }
 0xe3d   :  { %3252 = vmatpush.msrb.mxu0 %v4037_v9 }
 0xe4d   :  { %v2988_v36 = vpop.permute.xlu2 %2987 }
 0xe4e   :  { %v2989_v37 = vsel %vm200_vm1, %v2988_v36, 0 }
 0xe4f   :  { %v3011_v51 = vand.u32 4294901760, %v2989_v37 }
 0xe51   :  { %v3012_v52 = vsub.f32 %v2989_v37, %v3011_v51  ;;  %3057 = vmatmul.f32.vlgmr.msrb.gmra.mxu3 %v3011_v51 }
 0xe52   :  { %3346 = vmatpush.msrb.mxu3 %v4031_v3 }
 0xe53   :  { %v3013_v42 = vand.u32 4294901760, %v3012_v52  ;;  %3087 = vmatmul.f32.vlgmr.msra.gmra.mxu0 %v3012_v52 }
 0xe54   :  { %3348 = vmatpush.msrb.mxu3 %v4033_v4  ;;  %3375 = vmatpush.msra.mxu0 %v4070_v22 }
 0xe55   :  { %v3014_v45 = vsub.f32 %v3012_v52, %v3013_v42  ;;  %3114 = vmatmul.f32.vlgmr.msra.gmra.mxu1 %v3013_v42 }
 0xe56   :  { %3350 = vmatpush.msrb.mxu3 %v4035_v5  ;;  %3406 = vmatpush.msra.mxu1 %v4031_v3 }
 0xe57   :  { %v3015_v30 = vand.u32 4294901760, %v3014_v45  ;;  %3379 = vmatpush.msra.mxu0 %v4073_v23 }
 0xe58   :  { %3352 = vmatpush.msrb.mxu3 %v4037_v9  ;;  %3408 = vmatpush.msra.mxu1 %v4033_v4 }
 0xe59   :  { %3016 = vmatmul.f32.vlgmr.msrb.gmra.mxu2 %v3015_v30  ;;  %3172 = vmatmul.f32.vlgmr.msra.gmra.mxu3 %v3011_v51 }
 0xe5a   :  { %3317 = vmatpush.msrb.mxu2 %v4045_v14  ;;  %3410 = vmatpush.msra.mxu1 %v4035_v5 }
 0xe5b   :  { %3383 = vmatpush.msra.mxu0 %v4076_v24  ;;  %3469 = vmatpush.msra.mxu3 %v4122_v41  ;;  %v3884_v41 = vld [vmem:[%s4300_s1] sm:$0x3] }
 0xe5c   :  { %3320 = vmatpush.msrb.mxu2 %v4049_v15  ;;  %3412 = vmatpush.msra.mxu1 %v4037_v9  ;;  %v3883_v15 = vld [vmem:[%s4303_s30] sm:$0x3] }
 0xe5d   :  { %3387 = vmatpush.msra.mxu0 %v4086_v27  ;;  %3475 = vmatpush.msra.mxu3 %v4130_v44 }
 0xe5e   :  { %3323 = vmatpush.msrb.mxu2 %v4052_v16  ;;  %v177_v16 = vrot.slane %v3883_v15, 7 }
 0xe5f   :  { %3481 = vmatpush.msra.mxu3 %v4142_v47 }
 0xe60   :  { %3326 = vmatpush.msrb.mxu2 %v4057_v18  ;;  %v179_v44 = vsel %vm82_vm0, %v3884_v41, %v177_v16 }
 0xe61   :  { %3147 = vmatmul.f32.vlgmr.msra.gmra.mxu2 %v3011_v51  ;;  %3487 = vmatpush.msra.mxu3 %v4148_v48 }
 0xe62   :  { %3436 = vmatpush.msra.mxu2 %v4039_v10 }
 0xe64   :  { %3438 = vmatpush.msra.mxu2 %v4041_v11 }
 0xe66   :  { %3440 = vmatpush.msra.mxu2 %v4054_v17 }
 0xe68   :  { %3442 = vmatpush.msra.mxu2 %v4065_v21 }
 0xea3   :  { %v2868_v3 = vpop.f32.mrf.mxu1 }
 0xeab   :  { %v2827_v4 = vpop.f32.mrf.mxu0  ;;  %v2898_v9 = vpop.f32.mrf.mxu2 }
 0xeac   :  { %v2869_v5 = vadd.f32 %v2868_v3, %v2827_v4  ;;  %v2983_v27 = vpop.f32.mrf.mxu1 }
 0xead   :  { %v2925_v18 = vpop.f32.mrf.mxu3 }
 0xeae   :  { %v2899_v14 = vadd.f32 %v2898_v9, %v2869_v5 }
 0xeb0   :  { %v2926_v22 = vadd.f32 %v2925_v18, %v2899_v14 }
 0xeb3   :  { %v2958_v23 = vpop.f32.mrf.mxu0 }
 0xeb4   :  { %v2959_v24 = vadd.f32 %v2958_v23, %v2926_v22 }
 0xeb6   :  { %v2984_v47 = vadd.f32 %v2983_v27, %v2959_v24 }
 0xeb8   :  { %v2986_v48 = vadd.f32 %v2984_v47, %v179_v44 }
 0xeba   :  { %3859 = vtanh.f32 %v2986_v48  ;;  %v3177_v50 = vmul.f32 0.5, %v2986_v48 }
 0xec0   :  { %v3860_v53 = vpop.eup %3859 }
 0xec1   :  { %3189 = vrot.lane.b32.xlu0 %v3860_v53, %s3991_s16 }
 0xed0   :  { %v3088_v31 = vpop.f32.mrf.mxu0 }
 0xed2   :  { %v3115_v60 = vpop.f32.mrf.mxu1 }
 0xed4   :  { %v3058_v40 = vpop.f32.mrf.mxu3 }
 0xedc   :  { %v3017_v2 = vpop.f32.mrf.mxu2  ;;  %v3173_v43 = vpop.f32.mrf.mxu3 }
 0xedd   :  { %v3059_v0 = vadd.f32 %v3058_v40, %v3017_v2 }
 0xedf   :  { %v3089_v46 = vadd.f32 %v3088_v31, %v3059_v0 }
 0xee1   :  { %v3116_v56 = vadd.f32 %v3115_v60, %v3089_v46  ;;  %v3887_v46 = vld [vmem:[%s4217_s15] sm:$0x3] }
 0xee2   :  { %v193_v58 = vrot.slane %v3887_v46, 7 }
 0xee4   :  { %v3148_v63 = vpop.f32.mrf.mxu2 }
 0xee5   :  { %v3149_v54 = vadd.f32 %v3148_v63, %v3116_v56 }
 0xee7   :  { %v3174_v34 = vadd.f32 %v3173_v43, %v3149_v54  ;;  %v3888_v43 = vld [vmem:[%s4214_s14] sm:$0x3] }
 0xee8   :  { %v195_v61 = vsel %vm82_vm0, %v3888_v43, %v193_v58 }
 0xee9   :  { %v3176_v35 = vadd.f32 %v3174_v34, %v103_v12 }
 0xeeb   :  { %3861 = vtanh.f32 %v3176_v35  ;;  %v3182_v45 = vmul.f32 0.5, %v3176_v35 }
 0xeec   :  { %3863 = vtanh.f32 %v3177_v50 }
 0xeed   :  { %3865 = vtanh.f32 %v3182_v45 }
 0xef1   :  { %v3862_v1 = vpop.eup %3861 }
 0xef2   :  { %3200 = vrot.lane.b32.xlu1 %v3862_v1, %s3991_s16  ;;  %v3864_v36 = vpop.eup %3863 }
 0xef3   :  { %v3179_v37 = vmul.f32 0.5, %v3864_v36  ;;  %v3866_v30 = vpop.eup %3865 }
 0xef4   :  { %v3184_v3 = vmul.f32 0.5, %v3866_v30 }
 0xef5   :  { %v3180_v51 = vadd.f32 0.5, %v3179_v37 }
 0xef6   :  { %v3185_v4 = vadd.f32 0.5, %v3184_v3 }
 0xef7   :  { %v3187_v14 = vmul.f32 %v3180_v51, %v4642_v6 }
 0xef8   :  { %v3198_v22 = vmul.f32 %v3185_v4, %v4647_v13 }
 0xf33   :  { %v3190_v52 = vpop.permute.xlu0 %3189 }
 0xf34   :  { %v3192_v42 = vmul.f32 %v3190_v52, %v3180_v51  ;;  %v3889_v52 = vld [vmem:[%s4210_s11] sm:$0x3] }
 0xf36   :  { %3194 = vrot.lane.b32.xlu2 %v3192_v42, %s3985_s24  ;;  %v85_v42 = vrot.slane %v3889_v52, 1 }
 0xf64   :  { %v3201_v5 = vpop.permute.xlu1 %3200 }
 0xf65   :  { %v3203_v9 = vmul.f32 %v3201_v5, %v3185_v4 }
 0xf67   :  { %3205 = vrot.lane.b32.xlu0 %v3203_v9, %s3985_s24  ;;  %v3890_v9 = vld [vmem:[%s4207_s9] sm:$0x3]  ;;  %s3992_s9 = smov 96  }
 0xf90   :  { %v3195_v15 = vpop.permute.xlu2 %3194 }
 0xf91   :  { %v4720_v16 = vadd.f32 %v3195_v15, %v3187_v14  ;;  %v87_v14 = vsel %vm82_vm0, %v85_v42, %v3890_v9 }
 0xf93   :  { %3867 = vtanh.f32 %v4720_v16 }
 0xf99   :  { %v3868_v18 = vpop.eup %3867 }
 0xf9a   :  { %3211 = vrot.lane.b32.xlu1 %v3868_v18, %s3991_s16 }
 0xfd9   :  { %v3206_v23 = vpop.permute.xlu0 %3205 }
 0xfda   :  { %v4725_v24 = vadd.f32 %v3206_v23, %v3198_v22 }
 0xfdc   :  { %3869 = vtanh.f32 %v4725_v24 }
 0xfe2   :  { %v3870_v27 = vpop.eup %3869 }
 0xfe3   :  { %3217 = vrot.lane.b32.xlu2 %v3870_v27, %s3991_s16 }
0x100c   :  { %v3212_v41 = vpop.permute.xlu1 %3211 }
0x100d   :  { %v3214_v6 = vmul.f32 %v3212_v41, %v3180_v51 }
0x100f   :  { %3222 = vrot.lane.b32.xlu0 %v3214_v6, %s3985_s24 }
0x103d   :  { %v3218_v44 = vpop.permute.xlu2 %3217 }
0x103e   :  { %v4730_v47 = vmul.f32 %v3218_v44, %v3185_v4 }
0x1040   :  { %3419 = vrot.lane.b32.xlu1 %v4730_v47, %s3985_s24 }
0x1081   :  { %v4734_v48 = vpop.permute.xlu0 %3222 }
0x1082   :  { %v3231_v13 = vsel %vm200_vm1, %v4734_v48, 0 }
0x1083   :  { %v3253_v53 = vand.u32 4294901760, %v3231_v13 }
0x1085   :  { %v3254_v40 = vsub.f32 %v3231_v13, %v3253_v53  ;;  %3299 = vmatmul.f32.vlgmr.msrb.gmra.mxu1 %v3253_v53 }
0x1086   :  { %3536 = vmatpush.msrb.mxu1 %v4039_v10 }
0x1087   :  { %v3255_v2 = vand.u32 4294901760, %v3254_v40  ;;  %3329 = vmatmul.f32.vlgmr.msrb.gmra.mxu2 %v3254_v40 }
0x1088   :  { %3538 = vmatpush.msrb.mxu1 %v4041_v11  ;;  %3565 = vmatpush.msrb.mxu2 %v4083_v26 }
0x1089   :  { %v3256_v0 = vsub.f32 %v3254_v40, %v3255_v2  ;;  %3356 = vmatmul.f32.vlgmr.msrb.gmra.mxu3 %v3255_v2 }
0x108a   :  { %3540 = vmatpush.msrb.mxu1 %v4054_v17  ;;  %3596 = vmatpush.msrb.mxu3 %v4039_v10 }
0x108b   :  { %v3257_v31 = vand.u32 4294901760, %v3256_v0  ;;  %3569 = vmatpush.msrb.mxu2 %v4089_v28 }
0x108c   :  { %3542 = vmatpush.msrb.mxu1 %v4065_v21  ;;  %3598 = vmatpush.msrb.mxu3 %v4041_v11 }
0x108d   :  { %3258 = vmatmul.f32.vlgmr.msrb.gmra.mxu0 %v3257_v31  ;;  %3414 = vmatmul.f32.vlgmr.msra.gmra.mxu1 %v3253_v53 }
0x108e   :  { %3507 = vmatpush.msrb.mxu0 %v4060_v19  ;;  %3600 = vmatpush.msrb.mxu3 %v4054_v17 }
0x108f   :  { %3573 = vmatpush.msrb.mxu2 %v4103_v33 }
0x1090   :  { %3510 = vmatpush.msrb.mxu0 %v4063_v20  ;;  %3602 = vmatpush.msrb.mxu3 %v4065_v21 }
0x1091   :  { %3577 = vmatpush.msrb.mxu2 %v4119_v39 }
0x1092   :  { %3513 = vmatpush.msrb.mxu0 %v4079_v25 }
0x1094   :  { %3516 = vmatpush.msrb.mxu0 %v4092_v29 }
0x1095   :  { %3389 = vmatmul.f32.vlgmr.msra.gmra.mxu0 %v3253_v53 }
0x10b2   :  { %v3420_v10 = vpop.permute.xlu1 %3419 }
0x10b3   :  { %v3421_v11 = vsel %vm200_vm1, %v3420_v10, 0 }
0x10b4   :  { %v3443_v26 = vand.u32 4294901760, %v3421_v11 }
0x10b6   :  { %v3444_v19 = vsub.f32 %v3421_v11, %v3443_v26  ;;  %3489 = vmatmul.f32.vlgmr.msra.gmra.mxu3 %v3443_v26 }
0x10b8   :  { %v3445_v17 = vand.u32 4294901760, %v3444_v19  ;;  %3519 = vmatmul.f32.vlgmr.msrb.gmra.mxu0 %v3444_v19 }
0x10ba   :  { %v3446_v28 = vsub.f32 %v3444_v19, %v3445_v17  ;;  %3546 = vmatmul.f32.vlgmr.msrb.gmra.mxu1 %v3445_v17 }
0x10bc   :  { %v3447_v20 = vand.u32 4294901760, %v3446_v28 }
0x10be   :  { %3448 = vmatmul.f32.vlgmr.msra.gmra.mxu2 %v3447_v20  ;;  %3604 = vmatmul.f32.vlgmr.msrb.gmra.mxu3 %v3443_v26 }
0x10c6   :  { %3579 = vmatmul.f32.vlgmr.msrb.gmra.mxu2 %v3443_v26 }
0x1102   :  { %v3300_v21 = vpop.f32.mrf.mxu1 }
0x110a   :  { %v3259_v25 = vpop.f32.mrf.mxu0  ;;  %v3330_v33 = vpop.f32.mrf.mxu2 }
0x110b   :  { %v3301_v29 = vadd.f32 %v3300_v21, %v3259_v25  ;;  %v3415_v54 = vpop.f32.mrf.mxu1 }
0x110c   :  { %v3357_v59 = vpop.f32.mrf.mxu3 }
0x110d   :  { %v3331_v39 = vadd.f32 %v3330_v33, %v3301_v29 }
0x110f   :  { %v3358_v60 = vadd.f32 %v3357_v59, %v3331_v39 }
0x1112   :  { %v3390_v56 = vpop.f32.mrf.mxu0 }
0x1113   :  { %v3391_v63 = vadd.f32 %v3390_v56, %v3358_v60 }
0x1115   :  { %v3416_v12 = vadd.f32 %v3415_v54, %v3391_v63 }
0x1117   :  { %v3418_v34 = vadd.f32 %v3416_v12, %v195_v61 }
0x1119   :  { %3871 = vtanh.f32 %v3418_v34  ;;  %v3609_v23 = vmul.f32 0.5, %v3418_v34 }
0x111f   :  { %v3872_v35 = vpop.eup %3871 }
0x1120   :  { %3621 = vrot.lane.b32.xlu2 %v3872_v35, %s3991_s16 }
0x1135   :  { %v3520_v37 = vpop.f32.mrf.mxu0 }
0x1137   :  { %v3547_v45 = vpop.f32.mrf.mxu1 }
0x1139   :  { %v3490_v1 = vpop.f32.mrf.mxu3 }
0x1141   :  { %v3449_v50 = vpop.f32.mrf.mxu2  ;;  %v3605_v5 = vpop.f32.mrf.mxu3 }
0x1142   :  { %v3491_v36 = vadd.f32 %v3490_v1, %v3449_v50 }
0x1144   :  { %v3521_v51 = vadd.f32 %v3520_v37, %v3491_v36 }
0x1146   :  { %v3548_v30 = vadd.f32 %v3547_v45, %v3521_v51 }
0x1149   :  { %v3580_v3 = vpop.f32.mrf.mxu2 }
0x114a   :  { %v3581_v4 = vadd.f32 %v3580_v3, %v3548_v30 }
0x114c   :  { %v3606_v15 = vadd.f32 %v3605_v5, %v3581_v4 }
0x114e   :  { %v3608_v18 = vadd.f32 %v3606_v15, %v87_v14 }
0x1150   :  { %3873 = vtanh.f32 %v3608_v18  ;;  %v3614_v53 = vmul.f32 0.5, %v3608_v18 }
0x1151   :  { %3875 = vtanh.f32 %v3609_v23 }
0x1152   :  { %3877 = vtanh.f32 %v3614_v53 }
0x1156   :  { %v3874_v22 = vpop.eup %3873 }
0x1157   :  { %3632 = vrot.lane.b32.xlu0 %v3874_v22, %s3991_s16  ;;  %v3876_v27 = vpop.eup %3875 }
0x1158   :  { %v3611_v41 = vmul.f32 0.5, %v3876_v27  ;;  %v3878_v40 = vpop.eup %3877 }
0x1159   :  { %v3616_v2 = vmul.f32 0.5, %v3878_v40 }
0x115a   :  { %v3612_v6 = vadd.f32 0.5, %v3611_v41 }
0x115b   :  { %v3617_v0 = vadd.f32 0.5, %v3616_v2 }
0x115c   :  { %v3619_v11 = vmul.f32 %v3612_v6, %v4720_v16 }
0x117a   :  { %v3622_v44 = vpop.permute.xlu2 %3621 }
0x117b   :  { %v3624_v13 = vmul.f32 %v3622_v44, %v3612_v6 }
0x117d   :  { %3626 = vrot.lane.b32.xlu1 %v3624_v13, %s3985_s24 }
0x11c9   :  { %v3633_v31 = vpop.permute.xlu0 %3632 }
0x11ca   :  { %v3635_v10 = vmul.f32 %v3633_v31, %v3617_v0 }
0x11cc   :  { %3637 = vrot.lane.b32.xlu2 %v3635_v10, %s3985_s24 }
0x11d4   :  { %627 = vrot.lane.b32.xlu2 %v4234_v32, %s3991_s16  ;;  %v3630_v32 = vmul.f32 %v3617_v0, %v4725_v24 }
0x11dc   :  { %1930 = vrot.lane.b32.xlu2 %v4495_v57, %s3991_s16 }
0x11e4   :  { %2363 = vrot.lane.b32.xlu2 %v4574_v8, %s3991_s16 }
0x11ef   :  { %v3627_v26 = vpop.permute.xlu1 %3626 }
0x11f0   :  { %v3629_v19 = vadd.f32 %v3627_v26, %v3619_v11 }
0x11f2   :  { %3879 = vtanh.f32 %v3629_v19 }
0x11f8   :  { %v3880_v17 = vpop.eup %3879 }
0x11f9   :  { %3643 = vrot.lane.b32.xlu0 %v3880_v17, %s3991_s16 }
0x1201   :  { %1062 = vrot.lane.b32.xlu0 %v4321_v55, %s3991_s16 }
0x1209   :  { %3664 = vrot.lane.b32.xlu0 %v3629_v19, %s3992_s9 }
0x1211   :  { %2795 = vrot.lane.b32.xlu0 %v4652_v62, %s3991_s16 }
0x1226   :  { %v3638_v57 = vpop.permute.xlu2 %3637 }
0x1227   :  { %v3640_v8 = vadd.f32 %v3638_v57, %v3630_v32 }
0x1229   :  { %3881 = vtanh.f32 %v3640_v8 }
0x122e   :  { %v628_v16 = vpop.permute.xlu2 %627 }
0x122f   :  { %v3882_v28 = vpop.eup %3881  ;;  %3762 = vst.msk [vmem:[%s4847_s3 + $0xe] sm:$0x3] %vm631_vm3, %v628_v16 }
0x1230   :  { %3649 = vrot.lane.b32.xlu1 %v3882_v28, %s3991_s16 }
0x1236   :  { %v1931_v55 = vpop.permute.xlu2 %1930 }
0x1237   :  { %3768 = vst.msk [vmem:[%s4847_s3 + $0x8] sm:$0x3] %vm631_vm3, %v1931_v55 }
0x1238   :  { %3769 = vst.msk [vmem:[%s4847_s3 + $0x8] sm:$0x3] %vm624_vm2, %v4578_v7  ;;  %1496 = vrot.lane.b32.xlu1 %v4408_v38, %s3991_s16 }
0x123e   :  { %v2364_v62 = vpop.permute.xlu2 %2363 }
0x123f   :  { %3770 = vst.msk [vmem:[%s4847_s3 + $0x6] sm:$0x3] %vm631_vm3, %v2364_v62 }
0x1240   :  { %3669 = vrot.lane.b32.xlu1 %v3640_v8, %s3992_s9 }
0x1248   :  { %3227 = vrot.lane.b32.xlu1 %v4730_v47, %s3991_s16 }
0x126b   :  { %v3644_v24 = vpop.permute.xlu0 %3643 }
0x126c   :  { %v3646_v20 = vmul.f32 %v3644_v24, %v3612_v6 }
0x126e   :  { %3654 = vrot.lane.b32.xlu2 %v3646_v20, %s3985_s24 }
0x1273   :  { %v1063_v21 = vpop.permute.xlu0 %1062 }
0x1274   :  { %3764 = vst.msk [vmem:[%s4847_s3 + $0xc] sm:$0x3] %vm631_vm3, %v1063_v21 }
0x1275   :  { %3773 = vst.msk [vmem:[%s4847_s3 + $0xc] sm:$0x3] %vm624_vm2, %v4734_v48 }
0x127b   :  { %v3665_v38 = vpop.permute.xlu0 %3664 }
0x127c   :  { %3667 = vst.msk [vmem:[#allocation9] sm:$0x3] %vm624_vm2, %v3665_v38 }
0x1283   :  { %v2796_v7 = vpop.permute.xlu0 %2795 }
0x1284   :  { %3772 = vst.msk [vmem:[%s4847_s3 + $0x4] sm:$0x3] %vm631_vm3, %v2796_v7 }
0x12a2   :  { %v3650_v47 = vpop.permute.xlu1 %3649 }
0x12a3   :  { %v3652_v25 = vmul.f32 %v3650_v47, %v3617_v0 }
0x12a5   :  { %3659 = vrot.lane.b32.xlu0 %v3652_v25, %s3991_s16 }
0x12aa   :  { %v1497_v29 = vpop.permute.xlu1 %1496 }
0x12ab   :  { %3766 = vst.msk [vmem:[%s4847_s3 + $0xa] sm:$0x3] %vm631_vm3, %v1497_v29 }
0x12ac   :  { %3771 = vst.msk [vmem:[%s4847_s3 + $0xa] sm:$0x3] %vm624_vm2, %v4656_v49 }
0x12b2   :  { %v3670_v48 = vpop.permute.xlu1 %3669 }
0x12b3   :  { %3673 = vst.msk [vmem:[#allocation9 + $0x2] sm:$0x3] %vm624_vm2, %v3670_v48 }
0x12b4   :  { %3688 = dma.vmem_to_hbm [thread:$0]  %s3681_s12, 64, %s3683_s18, [#allocation4], %s3985_s24, %s3985_s24, %s3986_s25  }
0x12ba   :  { %v3228_v33 = vpop.permute.xlu1 %3227 }
0x12bb   :  { %3774 = vst.msk [vmem:[%s4847_s3 + $0x2] sm:$0x3] %vm631_vm3, %v3228_v33 }
0x12c8   :  { %v3655_v49 = vpop.permute.xlu2 %3654 }
0x12c9   :  { %3775 = vst.msk [vmem:[%s4847_s3 + $0xe] sm:$0x3] %vm624_vm2, %v3655_v49 }
0x1317   :  { %v3660_v39 = vpop.permute.xlu0 %3659 }
0x1318   :  { %3662 = vst.msk [vmem:[%s4847_s3] sm:$0x3] %vm631_vm3, %v3660_v39 }
0x1319   :  { %3981 = dma.done.wait [#allocation4], 64  }
0x131a   :  { %3982 = vsyncadd [#allocation4], 4294967232 }
0x131b   :  { %3695 = vsyncpa [#allocation3], 1 }
0x131c   :  { %3696 = vsyncpa [#allocation8], 1 }
0x131d   :  { %3697 = vsyncpa [#allocation4], 1 }
0x131e   :  { %3698 = vsyncpa [#allocation5], 1 }

</bundles_post_ra>
